<compile_context>
chip_gen: v5e
topology: v5e:2x2
jax: 0.10.0
libtpu: 0.0.40
codegen_flags: <defaults>
</compile_context>

<pallas_src>
import jax
import jax.numpy as jnp
from jax import lax
from jax.experimental import pallas as pl
from jax.experimental.pallas import tpu as pltpu

K = 3  # kernel_size=3, stride=1, pad=1 (ConvBn defaults)


def _conv_stats_kernel(x_ref, w_ref, y_ref, sum_ref, sq_ref):
    # x_ref:   (Hp, Wp, Cin)    padded NHWC image of one batch element
    # w_ref:   (Cout, K*K*Cin)  conv weight, tap-major / channel-minor
    # y_ref:   (Cout, H*W)      conv output, channel-major (lane-dense)
    # sum_ref: (Cout, 1)        per-block  sum_{h,w} y
    # sq_ref:  (Cout, 1)        per-block  sum_{h,w} y^2
    Hp, Wp, Cin = x_ref.shape
    H, W = Hp - (K - 1), Wp - (K - 1)

    # im2col in VMEM: nine shifted (H, W, Cin) windows concatenated along the
    # channel (lane) axis, then a free leading-dim merge to (H*W, 9*Cin).
    taps = [x_ref[kh:kh + H, kw:kw + W, :]
            for kh in range(K) for kw in range(K)]
    patches = jnp.concatenate(taps, axis=-1).reshape(H * W, K * K * Cin)

    # Single MXU push: (Cout, 9*Cin) x (H*W, 9*Cin)^T -> (Cout, H*W).
    y = lax.dot_general(w_ref[...], patches,
                        dimension_numbers=(((1,), (1,)), ((), ())),
                        preferred_element_type=jnp.float32)

    y_ref[...] = y
    # fused partial BN statistics (avoids extra HBM passes for mean/var)
    sum_ref[...] = jnp.sum(y, axis=1, keepdims=True)
    sq_ref[...] = jnp.sum(y * y, axis=1, keepdims=True)


def _bn_apply_kernel(y_ref, s_ref, b_ref, o_ref):
    # y_ref/o_ref: (Cout, H*W); s_ref/b_ref: (Cout, 1) broadcast along lanes.
    o_ref[...] = y_ref[...] * s_ref[...] + b_ref[...]


@jax.jit
def conv_bn(x_nchw, weight, gamma, beta, eps=1e-5):
    """Forward pass of ConvBn: bn(conv(x)) with training-mode batch stats.

    x_nchw: (N, Cin, H, W) f32, weight: (Cout, Cin, K, K), gamma/beta: (Cout,).
    Returns (N, Cout, H, W).
    """
    N, Cin, H, W = x_nchw.shape
    Cout = weight.shape[0]
    Hp, Wp = H + 2, W + 2
    HW = H * W

    # layout glue: NCHW -> NHWC and a single zero-pad of H and W (no unfold).
    xp = jnp.pad(jnp.transpose(x_nchw, (0, 2, 3, 1)),
                 ((0, 0), (1, 1), (1, 1), (0, 0)))
    # weight (Cout, Cin, K, K) -> (Cout, K*K*Cin), tap-major to match patches.
    w2 = jnp.transpose(weight, (0, 2, 3, 1)).reshape(Cout, K * K * Cin)

    cparams = pltpu.CompilerParams(
        dimension_semantics=("parallel",),
        vmem_limit_bytes=32 * 1024 * 1024)

    conv_y, psum, psq = pl.pallas_call(
        _conv_stats_kernel,
        out_shape=(
            jax.ShapeDtypeStruct((N, Cout, HW), jnp.float32),
            jax.ShapeDtypeStruct((N, Cout, 1), jnp.float32),
            jax.ShapeDtypeStruct((N, Cout, 1), jnp.float32),
        ),
        grid=(N,),
        in_specs=[
            pl.BlockSpec((None, Hp, Wp, Cin), lambda n: (n, 0, 0, 0)),
            pl.BlockSpec((Cout, K * K * Cin), lambda n: (0, 0)),
        ],
        out_specs=(
            pl.BlockSpec((None, Cout, HW), lambda n: (n, 0, 0)),
            pl.BlockSpec((None, Cout, 1), lambda n: (n, 0, 0)),
            pl.BlockSpec((None, Cout, 1), lambda n: (n, 0, 0)),
        ),
        compiler_params=cparams,
    )(xp, w2)

    # BatchNorm2d training-mode statistics (biased variance) from the fused
    # per-block sums; this reduction touches only (N, Cout)-sized arrays.
    count = N * HW
    mean = jnp.sum(psum, axis=(0, 2)) / count                 # (Cout,)
    var = jnp.sum(psq, axis=(0, 2)) / count - mean * mean     # biased
    inv_std = lax.rsqrt(var + eps)
    scale = (gamma * inv_std).reshape(Cout, 1)
    shift = (beta - mean * gamma * inv_std).reshape(Cout, 1)
    # NOTE: running_mean/running_var buffer updates are training bookkeeping
    # and do not affect the forward output, so they are not computed here.

    out_flat = pl.pallas_call(
        _bn_apply_kernel,
        out_shape=jax.ShapeDtypeStruct((N, Cout, HW), jnp.float32),
        grid=(N,),
        in_specs=[
            pl.BlockSpec((None, Cout, HW), lambda n: (n, 0, 0)),
            pl.BlockSpec((Cout, 1), lambda n: (0, 0)),
            pl.BlockSpec((Cout, 1), lambda n: (0, 0)),
        ],
        out_specs=pl.BlockSpec((None, Cout, HW), lambda n: (n, 0, 0)),
        input_output_aliases={0: 0},
        compiler_params=cparams,
    )(conv_y, scale, shift)

    # (N, Cout, H*W) is already channel-major: reshape back to NCHW for free.
    return out_flat.reshape(N, Cout, H, W)


if __name__ == "__main__":
    key = jax.random.PRNGKey(0)
    N, Cin, Cout, H, W = 2, 4, 8, 16, 16

    k1, k2 = jax.random.split(key)
    x = jax.random.normal(k1, (N, Cin, H, W), jnp.float32)
    weight = 0.1 * jax.random.normal(k2, (Cout, Cin, K, K), jnp.float32)
    gamma = jnp.ones((Cout,), jnp.float32)   # PyTorch BatchNorm2d affine init
    beta = jnp.zeros((Cout,), jnp.float32)

    out = jax.block_until_ready(conv_bn(x, weight, gamma, beta))

    # plain-JAX reference mirroring the PyTorch forward (training-mode BN)
    ref_conv = lax.conv_general_dilated(
        x, weight, window_strides=(1, 1), padding=((1, 1), (1, 1)),
        dimension_numbers=("NCHW", "OIHW", "NCHW"))
    m = jnp.mean(ref_conv, axis=(0, 2, 3), keepdims=True)
    v = jnp.mean(jnp.square(ref_conv - m), axis=(0, 2, 3), keepdims=True)
    ref = ((ref_conv - m) / jnp.sqrt(v + 1e-5)
           * gamma.reshape(1, -1, 1, 1) + beta.reshape(1, -1, 1, 1))

    assert out.shape == ref.shape, (out.shape, ref.shape)
    max_err = float(jnp.max(jnp.abs(out - ref)))
    assert jnp.allclose(out, ref, atol=1e-4, rtol=1e-4), max_err
    print("KERNEL_OK")
</pallas_src>

<mosaic_0001>
module attributes {stable_mosaic.version = 11 : i64} {
  func.func @_conv_stats_kernel(%arg0: i32, %arg1: memref<1x18x18x4xf32, #tpu.memory_space<vmem>>, %arg2: memref<8x36xf32, #tpu.memory_space<vmem>>, %arg3: memref<1x8x256xf32, #tpu.memory_space<vmem>>, %arg4: memref<1x8x1xf32, #tpu.memory_space<vmem>>, %arg5: memref<1x8x1xf32, #tpu.memory_space<vmem>>) attributes {dimension_semantics = [#tpu.dimension_semantics<parallel>], iteration_bounds = array<i64: 2>, scalar_prefetch = 0 : i64, scratch_operands = 0 : i64, tpu.core_type = #tpu.core_type<tc>, window_params = [{transform_indices = @transform_0, window_bounds = array<i64: 1, 18, 18, 4>}, {pipeline_mode = #tpu.pipeline_mode<synchronous>, transform_indices = @transform_1, window_bounds = array<i64: 8, 36>}, {transform_indices = @transform_2, window_bounds = array<i64: 1, 8, 256>}, {transform_indices = @transform_3, window_bounds = array<i64: 1, 8, 1>}, {transform_indices = @transform_4, window_bounds = array<i64: 1, 8, 1>}]} {
    %c0 = arith.constant 0 : index
    %c0_0 = arith.constant 0 : index
    %c0_1 = arith.constant 0 : index
    %c0_2 = arith.constant 0 : index
    %0 = vector.load %arg1[%c0, %c0_0, %c0_1, %c0_2] : memref<1x18x18x4xf32, #tpu.memory_space<vmem>>, vector<1x16x16x4xf32>
    %1 = vector.shape_cast %0 : vector<1x16x16x4xf32> to vector<16x16x4xf32>
    %c0_3 = arith.constant 0 : index
    %c0_4 = arith.constant 0 : index
    %c1 = arith.constant 1 : index
    %c0_5 = arith.constant 0 : index
    %2 = vector.load %arg1[%c0_3, %c0_4, %c1, %c0_5] : memref<1x18x18x4xf32, #tpu.memory_space<vmem>>, vector<1x16x16x4xf32>
    %3 = vector.shape_cast %2 : vector<1x16x16x4xf32> to vector<16x16x4xf32>
    %c0_6 = arith.constant 0 : index
    %c0_7 = arith.constant 0 : index
    %c2 = arith.constant 2 : index
    %c0_8 = arith.constant 0 : index
    %4 = vector.load %arg1[%c0_6, %c0_7, %c2, %c0_8] : memref<1x18x18x4xf32, #tpu.memory_space<vmem>>, vector<1x16x16x4xf32>
    %5 = vector.shape_cast %4 : vector<1x16x16x4xf32> to vector<16x16x4xf32>
    %c0_9 = arith.constant 0 : index
    %c1_10 = arith.constant 1 : index
    %c0_11 = arith.constant 0 : index
    %c0_12 = arith.constant 0 : index
    %6 = vector.load %arg1[%c0_9, %c1_10, %c0_11, %c0_12] : memref<1x18x18x4xf32, #tpu.memory_space<vmem>>, vector<1x16x16x4xf32>
    %7 = vector.shape_cast %6 : vector<1x16x16x4xf32> to vector<16x16x4xf32>
    %c0_13 = arith.constant 0 : index
    %c1_14 = arith.constant 1 : index
    %c1_15 = arith.constant 1 : index
    %c0_16 = arith.constant 0 : index
    %8 = vector.load %arg1[%c0_13, %c1_14, %c1_15, %c0_16] : memref<1x18x18x4xf32, #tpu.memory_space<vmem>>, vector<1x16x16x4xf32>
    %9 = vector.shape_cast %8 : vector<1x16x16x4xf32> to vector<16x16x4xf32>
    %c0_17 = arith.constant 0 : index
    %c1_18 = arith.constant 1 : index
    %c2_19 = arith.constant 2 : index
    %c0_20 = arith.constant 0 : index
    %10 = vector.load %arg1[%c0_17, %c1_18, %c2_19, %c0_20] : memref<1x18x18x4xf32, #tpu.memory_space<vmem>>, vector<1x16x16x4xf32>
    %11 = vector.shape_cast %10 : vector<1x16x16x4xf32> to vector<16x16x4xf32>
    %c0_21 = arith.constant 0 : index
    %c2_22 = arith.constant 2 : index
    %c0_23 = arith.constant 0 : index
    %c0_24 = arith.constant 0 : index
    %12 = vector.load %arg1[%c0_21, %c2_22, %c0_23, %c0_24] : memref<1x18x18x4xf32, #tpu.memory_space<vmem>>, vector<1x16x16x4xf32>
    %13 = vector.shape_cast %12 : vector<1x16x16x4xf32> to vector<16x16x4xf32>
    %c0_25 = arith.constant 0 : index
    %c2_26 = arith.constant 2 : index
    %c1_27 = arith.constant 1 : index
    %c0_28 = arith.constant 0 : index
    %14 = vector.load %arg1[%c0_25, %c2_26, %c1_27, %c0_28] : memref<1x18x18x4xf32, #tpu.memory_space<vmem>>, vector<1x16x16x4xf32>
    %15 = vector.shape_cast %14 : vector<1x16x16x4xf32> to vector<16x16x4xf32>
    %c0_29 = arith.constant 0 : index
    %c2_30 = arith.constant 2 : index
    %c2_31 = arith.constant 2 : index
    %c0_32 = arith.constant 0 : index
    %16 = vector.load %arg1[%c0_29, %c2_30, %c2_31, %c0_32] : memref<1x18x18x4xf32, #tpu.memory_space<vmem>>, vector<1x16x16x4xf32>
    %17 = vector.shape_cast %16 : vector<1x16x16x4xf32> to vector<16x16x4xf32>
    %18 = tpu.concatenate %1, %3, %5, %7, %9, %11, %13, %15, %17 in 2 : vector<16x16x4xf32>, vector<16x16x4xf32>, vector<16x16x4xf32>, vector<16x16x4xf32>, vector<16x16x4xf32>, vector<16x16x4xf32>, vector<16x16x4xf32>, vector<16x16x4xf32>, vector<16x16x4xf32> -> vector<16x16x36xf32>
    %19 = vector.shape_cast %18 : vector<16x16x36xf32> to vector<256x36xf32>
    %c0_33 = arith.constant 0 : index
    %c0_34 = arith.constant 0 : index
    %20 = vector.load %arg2[%c0_33, %c0_34] : memref<8x36xf32, #tpu.memory_space<vmem>>, vector<8x36xf32>
    %cst = arith.constant dense<0.000000e+00> : vector<8x256xf32>
    %21 = tpu.matmul %20, %19, %cst {dimension_numbers = #tpu.dot_dimension_numbers<[1], [1], [0], [0], [0, 0, 1, 0], [], []>} : vector<8x36xf32>, vector<256x36xf32>, vector<8x256xf32> -> vector<8x256xf32>
    %c0_35 = arith.constant 0 : index
    %c0_36 = arith.constant 0 : index
    %c0_37 = arith.constant 0 : index
    %22 = vector.load %arg3[%c0_35, %c0_36, %c0_37] : memref<1x8x256xf32, #tpu.memory_space<vmem>>, vector<1x8x256xf32>
    %23 = vector.shape_cast %22 : vector<1x8x256xf32> to vector<8x256xf32>
    %24 = vector.shape_cast %21 : vector<8x256xf32> to vector<1x8x256xf32>
    tpu.vector_store %arg3[%c0_35, %c0_36, %c0_37], %24 {strides = array<i32>} : memref<1x8x256xf32, #tpu.memory_space<vmem>>, vector<1x8x256xf32>,
    %cst_38 = arith.constant dense<0.000000e+00> : vector<8xf32>
    %25 = vector.multi_reduction <add>, %21, %cst_38 [1] : vector<8x256xf32> to vector<8xf32>
    %26 = vector.shape_cast %25 : vector<8xf32> to vector<8x1xf32>
    %c0_39 = arith.constant 0 : index
    %c0_40 = arith.constant 0 : index
    %c0_41 = arith.constant 0 : index
    %27 = vector.load %arg4[%c0_39, %c0_40, %c0_41] : memref<1x8x1xf32, #tpu.memory_space<vmem>>, vector<1x8x1xf32>
    %28 = vector.shape_cast %27 : vector<1x8x1xf32> to vector<8x1xf32>
    %29 = vector.shape_cast %26 : vector<8x1xf32> to vector<1x8x1xf32>
    tpu.vector_store %arg4[%c0_39, %c0_40, %c0_41], %29 {strides = array<i32>} : memref<1x8x1xf32, #tpu.memory_space<vmem>>, vector<1x8x1xf32>,
    %30 = arith.mulf %21, %21 : vector<8x256xf32>
    %cst_42 = arith.constant dense<0.000000e+00> : vector<8xf32>
    %31 = vector.multi_reduction <add>, %30, %cst_42 [1] : vector<8x256xf32> to vector<8xf32>
    %32 = vector.shape_cast %31 : vector<8xf32> to vector<8x1xf32>
    %c0_43 = arith.constant 0 : index
    %c0_44 = arith.constant 0 : index
    %c0_45 = arith.constant 0 : index
    %33 = vector.load %arg5[%c0_43, %c0_44, %c0_45] : memref<1x8x1xf32, #tpu.memory_space<vmem>>, vector<1x8x1xf32>
    %34 = vector.shape_cast %33 : vector<1x8x1xf32> to vector<8x1xf32>
    %35 = vector.shape_cast %32 : vector<8x1xf32> to vector<1x8x1xf32>
    tpu.vector_store %arg5[%c0_43, %c0_44, %c0_45], %35 {strides = array<i32>} : memref<1x8x1xf32, #tpu.memory_space<vmem>>, vector<1x8x1xf32>,
    return
  }
  func.func @transform_0(%arg0: i32) -> (i32, i32, i32, i32) {
    %c0_i32 = arith.constant 0 : i32
    %c0_i32_0 = arith.constant 0 : i32
    %c0_i32_1 = arith.constant 0 : i32
    %c0_i32_2 = arith.constant 0 : i32
    return %arg0, %c0_i32, %c0_i32_0, %c0_i32_1 : i32, i32, i32, i32
  }
  func.func @transform_1(%arg0: i32) -> (i32, i32) {
    %c0_i32 = arith.constant 0 : i32
    %c0_i32_0 = arith.constant 0 : i32
    %c0_i32_1 = arith.constant 0 : i32
    return %c0_i32, %c0_i32_0 : i32, i32
  }
  func.func @transform_2(%arg0: i32) -> (i32, i32, i32) {
    %c0_i32 = arith.constant 0 : i32
    %c0_i32_0 = arith.constant 0 : i32
    %c0_i32_1 = arith.constant 0 : i32
    return %arg0, %c0_i32, %c0_i32_0 : i32, i32, i32
  }
  func.func @transform_3(%arg0: i32) -> (i32, i32, i32) {
    %c0_i32 = arith.constant 0 : i32
    %c0_i32_0 = arith.constant 0 : i32
    %c0_i32_1 = arith.constant 0 : i32
    return %arg0, %c0_i32, %c0_i32_0 : i32, i32, i32
  }
  func.func @transform_4(%arg0: i32) -> (i32, i32, i32) {
    %c0_i32 = arith.constant 0 : i32
    %c0_i32_0 = arith.constant 0 : i32
    %c0_i32_1 = arith.constant 0 : i32
    return %arg0, %c0_i32, %c0_i32_0 : i32, i32, i32
  }
}

module attributes {stable_mosaic.version = 11 : i64} {
  func.func @_bn_apply_kernel(%arg0: i32, %arg1: memref<1x8x256xf32, #tpu.memory_space<vmem>>, %arg2: memref<8x1xf32, #tpu.memory_space<vmem>>, %arg3: memref<8x1xf32, #tpu.memory_space<vmem>>, %arg4: memref<1x8x256xf32, #tpu.memory_space<vmem>>) attributes {dimension_semantics = [#tpu.dimension_semantics<parallel>], iteration_bounds = array<i64: 2>, scalar_prefetch = 0 : i64, scratch_operands = 0 : i64, tpu.core_type = #tpu.core_type<tc>, window_params = [{transform_indices = @transform_0, window_bounds = array<i64: 1, 8, 256>}, {pipeline_mode = #tpu.pipeline_mode<synchronous>, transform_indices = @transform_1, window_bounds = array<i64: 8, 1>}, {pipeline_mode = #tpu.pipeline_mode<synchronous>, transform_indices = @transform_2, window_bounds = array<i64: 8, 1>}, {transform_indices = @transform_3, window_bounds = array<i64: 1, 8, 256>}]} {
    %c0 = arith.constant 0 : index
    %c0_0 = arith.constant 0 : index
    %c0_1 = arith.constant 0 : index
    %0 = vector.load %arg1[%c0, %c0_0, %c0_1] : memref<1x8x256xf32, #tpu.memory_space<vmem>>, vector<1x8x256xf32>
    %1 = vector.shape_cast %0 : vector<1x8x256xf32> to vector<8x256xf32>
    %c0_2 = arith.constant 0 : index
    %c0_3 = arith.constant 0 : index
    %2 = vector.load %arg2[%c0_2, %c0_3] : memref<8x1xf32, #tpu.memory_space<vmem>>, vector<8x1xf32>
    %3 = vector.broadcast %2 : vector<8x1xf32> to vector<8x256xf32>
    %4 = arith.mulf %1, %3 : vector<8x256xf32>
    %c0_4 = arith.constant 0 : index
    %c0_5 = arith.constant 0 : index
    %5 = vector.load %arg3[%c0_4, %c0_5] : memref<8x1xf32, #tpu.memory_space<vmem>>, vector<8x1xf32>
    %6 = vector.broadcast %5 : vector<8x1xf32> to vector<8x256xf32>
    %7 = arith.addf %4, %6 : vector<8x256xf32>
    %c0_6 = arith.constant 0 : index
    %c0_7 = arith.constant 0 : index
    %c0_8 = arith.constant 0 : index
    %8 = vector.load %arg4[%c0_6, %c0_7, %c0_8] : memref<1x8x256xf32, #tpu.memory_space<vmem>>, vector<1x8x256xf32>
    %9 = vector.shape_cast %8 : vector<1x8x256xf32> to vector<8x256xf32>
    %10 = vector.shape_cast %7 : vector<8x256xf32> to vector<1x8x256xf32>
    tpu.vector_store %arg4[%c0_6, %c0_7, %c0_8], %10 {strides = array<i32>} : memref<1x8x256xf32, #tpu.memory_space<vmem>>, vector<1x8x256xf32>,
    return
  }
  func.func @transform_0(%arg0: i32) -> (i32, i32, i32) {
    %c0_i32 = arith.constant 0 : i32
    %c0_i32_0 = arith.constant 0 : i32
    %c0_i32_1 = arith.constant 0 : i32
    return %arg0, %c0_i32, %c0_i32_0 : i32, i32, i32
  }
  func.func @transform_1(%arg0: i32) -> (i32, i32) {
    %c0_i32 = arith.constant 0 : i32
    %c0_i32_0 = arith.constant 0 : i32
    %c0_i32_1 = arith.constant 0 : i32
    return %c0_i32, %c0_i32_0 : i32, i32
  }
  func.func @transform_2(%arg0: i32) -> (i32, i32) {
    %c0_i32 = arith.constant 0 : i32
    %c0_i32_0 = arith.constant 0 : i32
    %c0_i32_1 = arith.constant 0 : i32
    return %c0_i32, %c0_i32_0 : i32, i32
  }
  func.func @transform_3(%arg0: i32) -> (i32, i32, i32) {
    %c0_i32 = arith.constant 0 : i32
    %c0_i32_0 = arith.constant 0 : i32
    %c0_i32_1 = arith.constant 0 : i32
    return %arg0, %c0_i32, %c0_i32_0 : i32, i32, i32
  }
}

</mosaic_0001>

<bundles_post_ra>
// kernel: conv_bn.3
= control target key start
LH: loop header
LB: loop body
LE: loop exit
PB: predicated region body
PF: predicated region fallthrough
CT: control target
= control target key end

     0   :  { %s298_s12 = smov 0   ;;  %s321_s0 = inlined_call_operand.vmem [shape: f32[2,8,256], index: 0, kind: input, shape index: {}, may-alias: {0,3}]   ;;  %s322_s1 = inlined_call_operand.vmem [shape: f32[8,1], index: 1, kind: input, shape index: {}]   ;;  %s323_s2 = inlined_call_operand.vmem [shape: f32[8,1], index: 2, kind: input, shape index: {}]   ;;  %s324_s3 = inlined_call_operand.vmem [shape: f32[2,8,256], index: 3, kind: output, shape index: {}, may-alias: {0,3}]  }
   0x1 LB: > { %s246_s13 = sadd.s32 4294967295, %s275_s12   ;;  %p250_p0 = scmp.ge.s32.totalorder %s275_s12, 1  ;;  %s275_s12 = sphi %s298_s12, %s13_s12  }
   0x2   : > { %p137_p1 = scmp.lt.s32.totalorder %s275_s12, 3 }
   0x4   : > { %p138_p2 = pnand %p250_p0, %p137_p1 }
   0x5   : > { %p161_p3 = scmp.lt.s32.totalorder (!%p138_p2), %s246_s13, 1 }
   0x6   : > { %141 = sbr.rel (%p138_p2) target bundleno = 140 (0x8c), region = 32 }
   0xb   : > { %v173_v0 = vld [vmem:[%s322_s1] sm:$0xff]  ;;  %v277_v1 = vmov 0   ;;  %s326_s13 = smov (!%p161_p3, %s246_s13), 1 }
   0xc   : > { %268 = vset.pattern.permute.xlu0 %v277_v1  ;;  %v181_v2 = vld [vmem:[%s323_s2] sm:$0xff]  ;;  %s257_s18 = sshll.u32 %s326_s13, 4 }
   0xd   : > { %176 = vperm.xlu0 %268, %v173_v0   ;;  %s165_s21 = scalar_lea.vmem %s321_s0, %s257_s18  ;;  %s170_s24 = scalar_lea.vmem %s324_s3, %s257_s18 }
   0xe   : > { %v171_v4 = vld [vmem:[%s165_s21] sm:$0xff]  ;;  %v172_v5 = vld [vmem:[%s165_s21 + $0x8] sm:$0xff] }
  0x15   : > { %184 = vperm.xlu0 %268, %v181_v2  }
  0x7f   : > { %v177_v3 = vpop.permute.xlu0 %176 }
  0x80   : > { %v179_v6 = vmul.f32 %v177_v3, %v171_v4  ;;  %v180_v7 = vmul.f32 %v177_v3, %v172_v5 }
  0x87   : > { %v185_v8 = vpop.permute.xlu0 %184 }
  0x88   : > { %v187_v9 = vadd.f32 %v185_v8, %v179_v6  ;;  %v188_v10 = vadd.f32 %v185_v8, %v180_v7 }
  0x8a   : > { %189 = vst [vmem:[%s170_s24] sm:$0xff] %v187_v9 }
  0x8b   : > { %190 = vst [vmem:[%s170_s24 + $0x8] sm:$0xff] %v188_v10 }
  0x8c PF: > { %s13_s12 = sadd.s32 1, %s275_s12  }
  0x8d   : > { %p10_p4 = scmp.ge.s32.totalorder %s13_s12, 4  }
  0x8f   :  { %12 = sbr.rel (!%p10_p4) target bundleno = 1 (0x1), region = 62 }

// kernel: conv_bn.2
= control target key start
LH: loop header
LB: loop body
LE: loop exit
PB: predicated region body
PF: predicated region fallthrough
CT: control target
= control target key end

     0   :  { %s2370_s15 = smov 0   ;;  %s4068_s0 = inlined_call_operand.vmem [shape: f32[2,18,18,4], index: 0, kind: input, shape index: {}]   ;;  %s4069_s1 = inlined_call_operand.vmem [shape: f32[8,36], index: 1, kind: input, shape index: {}]   ;;  %s4070_s2 = inlined_call_operand.vmem [shape: f32[2,8,256], index: 2, kind: output, shape index: {0}]   ;;  %s4071_s3 = inlined_call_operand.vmem [shape: f32[2,8,1], index: 3, kind: output, shape index: {1}]   ;;  %s4072_s4 = inlined_call_operand.vmem [shape: f32[2,8,1], index: 4, kind: output, shape index: {2}]  }
   0x1 LB: > { %s2068_s16 = sadd.s32 4294967295, %s2335_s15   ;;  %p2072_p0 = scmp.ge.s32.totalorder %s2335_s15, 1  ;;  %s2335_s15 = sphi %s2370_s15, %s15_s15  }
   0x2   : > { %p167_p1 = scmp.lt.s32.totalorder %s2335_s15, 3 }
   0x4   : > { %p168_p2 = pnand %p2072_p0, %p167_p1 }
   0x6   : > { %171 = sbr.rel (%p168_p2) target bundleno = 1065 (0x429), region = 28 }
   0xb   : > { %p201_p3 = scmp.lt.s32.totalorder %s2068_s16, 1  ;;  %s2337_s21 = smov 4   ;;  %vm1533_vm0 = vcmask 31744   ;;  %vm1566_vm1 = vcmask 64512   ;;  %vm1599_vm2 = vcmask 97280   ;;  %vm1632_vm3 = vcmask 130048  }
   0xc   : > { %s2338_s22 = smov 8   ;;  %s2339_s23 = smov 12   ;;  %vm1665_vm4 = vcmask 162816   ;;  %vm1698_vm5 = vcmask 195584   ;;  %vm1731_vm6 = vcmask 228352   ;;  %vm1764_vm7 = vcmask 261120  }
   0xd   : > { %s4336_s16 = smov (!%p201_p3, %s2068_s16), 1  ;;  %s2340_s24 = smov 16   ;;  %vm1798_vm8 = vcmask 293888   ;;  %vm1943_vm9 = vcmask 7168  }
   0xe   : > { %s2307_s17 = smul.u32 432, %s4336_s16  ;;  %s2341_s25 = smov 20  }
   0xf   : > { %s2342_s26 = smov 24   ;;  %s2343_s27 = smov 28  }
  0x10   : > { %s2384_s20 = scalar_lea.vmem %s4068_s0, %s2307_s17  ;;  %s2344_s28 = smov 32  }
  0x11   : > { %v2387_v0 = vld [vmem:[%s2384_s20 + $0x31] sm:$0xff]  ;;  %v2390_v1 = vld [vmem:[%s2384_s20 + $0x19] sm:$0xff]  ;;  %v251_v2 = vld [vmem:[%s2384_s20 + $0x1] sm:$0xff]  ;;  %s2306_s5 = sshll.u32 %s4336_s16, 4  ;;  %s2076_s9 = sshll.u32 %s4336_s16, 3 }
  0x12   : > { %549 = vrot.lane.b32.xlu2 %v2387_v0, %s2337_s21  ;;  %545 = vrot.lane.b32.xlu1 %v2390_v1, %s2337_s21  ;;  %v2399_v3 = vld [vmem:[%s2384_s20 + $0x39] sm:$0xff]  ;;  %v2402_v4 = vld [vmem:[%s2384_s20 + $0x21] sm:$0xff]  ;;  %s210_s8 = scalar_lea.vmem %s4070_s2, %s2306_s5  ;;  %s214_s12 = scalar_lea.vmem %s4071_s3, %s2076_s9 }
  0x13   : > { %541 = vrot.lane.b32.xlu0 %v251_v2, %s2337_s21  ;;  %v252_v5 = vld [vmem:[%s2384_s20 + $0x9] sm:$0xff]  ;;  %v2411_v6 = vld [vmem:[%s2384_s20 + $0x61] sm:$0xff]  ;;  %v2414_v7 = vld [vmem:[%s2384_s20 + $0x51] sm:$0xff]  ;;  %s218_s17 = scalar_lea.vmem %s4072_s4, %s2076_s9 }
  0x14   : > { %v2417_v8 = vld [vmem:[%s2384_s20 + $0x49] sm:$0xff]  ;;  %v2426_v9 = vld [vmem:[%s2384_s20 + $0x81] sm:$0xff]  ;;  %v2429_v10 = vld [vmem:[%s2384_s20 + $0x79] sm:$0xff] }
  0x15   : > { %v2432_v11 = vld [vmem:[%s2384_s20 + $0x69] sm:$0xff]  ;;  %v2444_v13 = vld [vmem:[%s2384_s20 + $0x99] sm:$0xff]  ;;  %v2447_v14 = vld [vmem:[%s2384_s20 + $0x91] sm:$0xff] }
  0x16   : > { %v2441_v12 = vld [vmem:[%s2384_s20 + $0xa9] sm:$0xff]  ;;  %v2459_v16 = vld [vmem:[%s2384_s20 + $0xc1] sm:$0xff]  ;;  %v2462_v17 = vld [vmem:[%s2384_s20 + $0xb1] sm:$0xff] }
  0x17   : > { %v2456_v15 = vld [vmem:[%s2384_s20 + $0xc9] sm:$0xff]  ;;  %v2471_v18 = vld [vmem:[%s2384_s20 + $0xf1] sm:$0xff]  ;;  %v2474_v19 = vld [vmem:[%s2384_s20 + $0xe1] sm:$0xff] }
  0x18   : > { %v2477_v20 = vld [vmem:[%s2384_s20 + $0xd9] sm:$0xff]  ;;  %v2486_v21 = vld [vmem:[%s2384_s20 + $0x111] sm:$0xff]  ;;  %v2489_v22 = vld [vmem:[%s2384_s20 + $0x109] sm:$0xff] }
  0x19   : > { %v2492_v23 = vld [vmem:[%s2384_s20 + $0xf9] sm:$0xff]  ;;  %v2504_v25 = vld [vmem:[%s2384_s20 + $0x129] sm:$0xff]  ;;  %v2507_v26 = vld [vmem:[%s2384_s20 + $0x121] sm:$0xff] }
  0x1a   : > { %551 = vrot.lane.b32.xlu2 %v2399_v3, %s2337_s21  ;;  %547 = vrot.lane.b32.xlu1 %v2402_v4, %s2337_s21  ;;  %v2501_v24 = vld [vmem:[%s2384_s20 + $0x139] sm:$0xff]  ;;  %v2519_v28 = vld [vmem:[%s2384_s20 + $0x151] sm:$0xff] }
  0x1b   : > { %543 = vrot.lane.b32.xlu0 %v252_v5, %s2337_s21  ;;  %v2516_v27 = vld [vmem:[%s2384_s20 + $0x159] sm:$0xff]  ;;  %v2522_v29 = vld [vmem:[%s2384_s20 + $0x141] sm:$0xff]  ;;  %v2532_v31 = vld [vmem:[%s2384_s20 + $0x171] sm:$0xff] }
  0x1c   : > { %v283_v30 = vld [vmem:[%s2384_s20 + $0x2] sm:$0xff]  ;;  %v2546_v34 = vld [vmem:[%s2384_s20 + $0x1a] sm:$0xff]  ;;  %v284_v35 = vld [vmem:[%s2384_s20 + $0xa] sm:$0xff] }
  0x1d   : > { %v2535_v32 = vld [vmem:[%s2384_s20 + $0x169] sm:$0xff]  ;;  %v2560_v38 = vld [vmem:[%s2384_s20 + $0x3a] sm:$0xff]  ;;  %v2563_v39 = vld [vmem:[%s2384_s20 + $0x32] sm:$0xff] }
  0x1e   : > { %v2543_v33 = vld [vmem:[%s2384_s20 + $0x22] sm:$0xff]  ;;  %v2557_v37 = vld [vmem:[%s2384_s20 + $0x4a] sm:$0xff]  ;;  %v2580_v43 = vld [vmem:[%s2384_s20 + $0x52] sm:$0xff] }
  0x1f   : > { %v2574_v41 = vld [vmem:[%s2384_s20 + $0x6a] sm:$0xff]  ;;  %v2577_v42 = vld [vmem:[%s2384_s20 + $0x62] sm:$0xff]  ;;  %v2591_v45 = vld [vmem:[%s2384_s20 + $0x92] sm:$0xff] }
  0x20   : > { %v2594_v46 = vld [vmem:[%s2384_s20 + $0x82] sm:$0xff]  ;;  %v2597_v47 = vld [vmem:[%s2384_s20 + $0x7a] sm:$0xff]  ;;  %v2612_v51 = vld [vmem:[%s2384_s20 + $0xb2] sm:$0xff] }
  0x21   : > { %v2615_v52 = vld [vmem:[%s2384_s20 + $0xaa] sm:$0xff]  ;;  %v2618_v53 = vld [vmem:[%s2384_s20 + $0x9a] sm:$0xff]  ;;  %v2639_v59 = vld [vmem:[%s2384_s20 + $0xc2] sm:$0xff] }
  0x22   : > { %557 = vrot.lane.b32.xlu2 %v2411_v6, %s2337_s21  ;;  %555 = vrot.lane.b32.xlu1 %v2414_v7, %s2337_s21  ;;  %v2633_v57 = vld [vmem:[%s2384_s20 + $0xda] sm:$0xff]  ;;  %v2636_v58 = vld [vmem:[%s2384_s20 + $0xca] sm:$0xff] }
  0x23   : > { %553 = vrot.lane.b32.xlu0 %v2417_v8, %s2337_s21  ;;  %v2654_v63 = vld [vmem:[%s2384_s20 + $0xfa] sm:$0xff]  ;;  %v2657_v2 = vld [vmem:[%s2384_s20 + $0xf2] sm:$0xff]  ;;  %v2660_v5 = vld [vmem:[%s2384_s20 + $0xe2] sm:$0xff] }
  0x2a   : > { %563 = vrot.lane.b32.xlu2 %v2426_v9, %s2337_s21  ;;  %561 = vrot.lane.b32.xlu1 %v2429_v10, %s2337_s21 }
  0x2b   : > { %559 = vrot.lane.b32.xlu0 %v2432_v11, %s2337_s21 }
  0x32   : > { %569 = vrot.lane.b32.xlu2 %v2441_v12, %s2337_s21  ;;  %567 = vrot.lane.b32.xlu1 %v2444_v13, %s2337_s21 }
  0x33   : > { %565 = vrot.lane.b32.xlu0 %v2447_v14, %s2337_s21 }
  0x3a   : > { %575 = vrot.lane.b32.xlu2 %v2456_v15, %s2337_s21  ;;  %573 = vrot.lane.b32.xlu1 %v2459_v16, %s2337_s21 }
  0x3b   : > { %571 = vrot.lane.b32.xlu0 %v2462_v17, %s2337_s21 }
  0x42   : > { %581 = vrot.lane.b32.xlu2 %v2471_v18, %s2337_s21  ;;  %579 = vrot.lane.b32.xlu1 %v2474_v19, %s2337_s21 }
  0x43   : > { %577 = vrot.lane.b32.xlu0 %v2477_v20, %s2337_s21 }
  0x4a   : > { %587 = vrot.lane.b32.xlu2 %v2486_v21, %s2337_s21  ;;  %585 = vrot.lane.b32.xlu1 %v2489_v22, %s2337_s21 }
  0x4b   : > { %583 = vrot.lane.b32.xlu0 %v2492_v23, %s2337_s21 }
  0x52   : > { %593 = vrot.lane.b32.xlu2 %v2501_v24, %s2337_s21  ;;  %591 = vrot.lane.b32.xlu1 %v2504_v25, %s2337_s21 }
  0x53   : > { %589 = vrot.lane.b32.xlu0 %v2507_v26, %s2337_s21 }
  0x5a   : > { %599 = vrot.lane.b32.xlu2 %v2516_v27, %s2337_s21  ;;  %597 = vrot.lane.b32.xlu1 %v2519_v28, %s2337_s21 }
  0x5b   : > { %595 = vrot.lane.b32.xlu0 %v2522_v29, %s2337_s21 }
  0x62   : > { %669 = vrot.lane.b32.xlu2 %v283_v30, %s2338_s22  ;;  %603 = vrot.lane.b32.xlu1 %v2532_v31, %s2337_s21 }
  0x63   : > { %601 = vrot.lane.b32.xlu0 %v2535_v32, %s2337_s21 }
  0x6a   : > { %675 = vrot.lane.b32.xlu2 %v2543_v33, %s2338_s22  ;;  %673 = vrot.lane.b32.xlu1 %v2546_v34, %s2338_s22 }
  0x6b   : > { %671 = vrot.lane.b32.xlu0 %v284_v35, %s2338_s22 }
  0x6c   : > { %v2554_v36 = vpop.permute.xlu2 %549 }
  0x6d   : > { %4113 = vst [vmem:[#allocation2_spill] sm:$0xff] %v2554_v36  ;;  %v2702_v36 = vld [vmem:[%s2384_s20 + $0x12a] sm:$0xff] }
  0x72   : > { %681 = vrot.lane.b32.xlu2 %v2557_v37, %s2338_s22  ;;  %679 = vrot.lane.b32.xlu1 %v2560_v38, %s2338_s22 }
  0x73   : > { %677 = vrot.lane.b32.xlu0 %v2563_v39, %s2338_s22 }
  0x74   : > { %v2571_v40 = vpop.permute.xlu2 %551 }
  0x75   : > { %4114 = vst [vmem:[#allocation3_spill] sm:$0xff] %v2571_v40  ;;  %v2681_v40 = vld [vmem:[%s2384_s20 + $0x10a] sm:$0xff] }
  0x7a   : > { %687 = vrot.lane.b32.xlu2 %v2574_v41, %s2338_s22  ;;  %685 = vrot.lane.b32.xlu1 %v2577_v42, %s2338_s22 }
  0x7b   : > { %683 = vrot.lane.b32.xlu0 %v2580_v43, %s2338_s22 }
  0x7c   : > { %v2588_v44 = vpop.permute.xlu2 %557 }
  0x7d   : > { %4115 = vst [vmem:[#allocation4_spill] sm:$0xff] %v2588_v44  ;;  %v2678_v44 = vld [vmem:[%s2384_s20 + $0x112] sm:$0xff] }
  0x82   : > { %693 = vrot.lane.b32.xlu2 %v2591_v45, %s2338_s22  ;;  %691 = vrot.lane.b32.xlu1 %v2594_v46, %s2338_s22 }
  0x83   : > { %689 = vrot.lane.b32.xlu0 %v2597_v47, %s2338_s22 }
  0x84   : > { %v2605_v48 = vpop.permute.xlu2 %563  ;;  %v2607_v49 = vpop.permute.xlu1 %545 }
  0x85   : > { %4116 = vst [vmem:[#allocation5_spill] sm:$0xff] %v2605_v48  ;;  %v2609_v50 = vpop.permute.xlu0 %541 }
  0x86   : > { %4117 = vst [vmem:[#allocation6_spill] sm:$0xff] %v2607_v49 }
  0x87   : > { %4118 = vst [vmem:[#allocation7_spill] sm:$0xff] %v2609_v50  ;;  %v2696_v50 = vld [vmem:[%s2384_s20 + $0x142] sm:$0xff] }
  0x88   : > { %4131 = vst [vmem:[#allocation20_spill] sm:$0xff] %v2696_v50 }
  0x8a   : > { %699 = vrot.lane.b32.xlu2 %v2612_v51, %s2338_s22  ;;  %697 = vrot.lane.b32.xlu1 %v2615_v52, %s2338_s22 }
  0x8b   : > { %695 = vrot.lane.b32.xlu0 %v2618_v53, %s2338_s22 }
  0x8c   : > { %v2626_v54 = vpop.permute.xlu2 %569  ;;  %v2628_v55 = vpop.permute.xlu1 %547 }
  0x8d   : > { %4119 = vst [vmem:[#allocation8_spill] sm:$0xff] %v2626_v54  ;;  %v2630_v56 = vpop.permute.xlu0 %543  ;;  %v2675_v54 = vld [vmem:[%s2384_s20 + $0x122] sm:$0xff] }
  0x8e   : > { %4120 = vst [vmem:[#allocation9_spill] sm:$0xff] %v2628_v55 }
  0x8f   : > { %4121 = vst [vmem:[#allocation10_spill] sm:$0xff] %v2630_v56  ;;  %v2717_v56 = vld [vmem:[%s2384_s20 + $0x16a] sm:$0xff] }
  0x90   : > { %4135 = vst [vmem:[#allocation24_spill] sm:$0xff] %v2717_v56 }
  0x92   : > { %705 = vrot.lane.b32.xlu2 %v2633_v57, %s2338_s22  ;;  %703 = vrot.lane.b32.xlu1 %v2636_v58, %s2338_s22 }
  0x93   : > { %701 = vrot.lane.b32.xlu0 %v2639_v59, %s2338_s22 }
  0x94   : > { %v2647_v60 = vpop.permute.xlu2 %575  ;;  %v2649_v61 = vpop.permute.xlu1 %555 }
  0x95   : > { %4122 = vst [vmem:[#allocation11_spill] sm:$0xff] %v2647_v60  ;;  %v2651_v62 = vpop.permute.xlu0 %553  ;;  %v2723_v60 = vld [vmem:[%s2384_s20 + $0x152] sm:$0xff] }
  0x96   : > { %4123 = vst [vmem:[#allocation12_spill] sm:$0xff] %v2649_v61  ;;  %v2699_v61 = vld [vmem:[%s2384_s20 + $0x13a] sm:$0xff] }
  0x97   : > { %4124 = vst [vmem:[#allocation13_spill] sm:$0xff] %v2651_v62 }
  0x98   : > { %4137 = vst [vmem:[#allocation26_spill] sm:$0xff] %v2723_v60 }
  0x9a   : > { %711 = vrot.lane.b32.xlu2 %v2654_v63, %s2338_s22  ;;  %709 = vrot.lane.b32.xlu1 %v2657_v2, %s2338_s22 }
  0x9b   : > { %707 = vrot.lane.b32.xlu0 %v2660_v5, %s2338_s22 }
  0x9c   : > { %v2668_v30 = vpop.permute.xlu2 %581  ;;  %v2670_v35 = vpop.permute.xlu1 %561 }
  0x9d   : > { %4125 = vst [vmem:[#allocation14_spill] sm:$0xff] %v2668_v30  ;;  %v2672_v48 = vpop.permute.xlu0 %559  ;;  %v2720_v30 = vld [vmem:[%s2384_s20 + $0x15a] sm:$0xff] }
  0x9e   : > { %4126 = vst [vmem:[#allocation15_spill] sm:$0xff] %v2670_v35 }
  0x9f   : > { %4127 = vst [vmem:[#allocation16_spill] sm:$0xff] %v2672_v48 }
  0xa0   : > { %4136 = vst [vmem:[#allocation25_spill] sm:$0xff] %v2720_v30 }
  0xa2   : > { %717 = vrot.lane.b32.xlu2 %v2675_v54, %s2338_s22  ;;  %715 = vrot.lane.b32.xlu1 %v2678_v44, %s2338_s22 }
  0xa3   : > { %713 = vrot.lane.b32.xlu0 %v2681_v40, %s2338_s22 }
  0xa4   : > { %v2689_v35 = vpop.permute.xlu2 %587  ;;  %v2691_v48 = vpop.permute.xlu1 %567 }
  0xa5   : > { %4128 = vst [vmem:[#allocation17_spill] sm:$0xff] %v2689_v35  ;;  %v2693_v62 = vpop.permute.xlu0 %565 }
  0xa6   : > { %4129 = vst [vmem:[#allocation18_spill] sm:$0xff] %v2691_v48 }
  0xa7   : > { %4130 = vst [vmem:[#allocation19_spill] sm:$0xff] %v2693_v62 }
  0xaa   : > { %723 = vrot.lane.b32.xlu2 %v2696_v50, %s2338_s22  ;;  %721 = vrot.lane.b32.xlu1 %v2699_v61, %s2338_s22  ;;  %v2738_v50 = vld [vmem:[%s2384_s20 + $0x172] sm:$0xff] }
  0xab   : > { %719 = vrot.lane.b32.xlu0 %v2702_v36, %s2338_s22  ;;  %4141 = vst [vmem:[#allocation30_spill] sm:$0xff] %v2738_v50 }
  0xac   : > { %v2710_v48 = vpop.permute.xlu2 %593  ;;  %v2712_v62 = vpop.permute.xlu1 %573 }
  0xad   : > { %4132 = vst [vmem:[#allocation21_spill] sm:$0xff] %v2710_v48  ;;  %v2714_v35 = vpop.permute.xlu0 %571 }
  0xae   : > { %4133 = vst [vmem:[#allocation22_spill] sm:$0xff] %v2712_v62  ;;  %v2765_v62 = vld [vmem:[%s2384_s20 + $0x30] sm:$0xff] }
  0xaf   : > { %4134 = vst [vmem:[#allocation23_spill] sm:$0xff] %v2714_v35  ;;  %v2741_v35 = vld [vmem:[%s2384_s20 + $0x18] sm:$0xff] }
  0xb0   : > { %4142 = vst [vmem:[#allocation31_spill] sm:$0xff] %v2741_v35 }
  0xb1   : > { %4149 = vst [vmem:[#allocation38_spill] sm:$0xff] %v2765_v62 }
  0xb2   : > { %729 = vrot.lane.b32.xlu2 %v2717_v56, %s2338_s22  ;;  %727 = vrot.lane.b32.xlu1 %v2720_v30, %s2338_s22  ;;  %v2744_v56 = vld [vmem:[%s2384_s20 + $0x20] sm:$0xff]  ;;  %v2762_v30 = vld [vmem:[%s2384_s20 + $0x48] sm:$0xff] }
  0xb3   : > { %725 = vrot.lane.b32.xlu0 %v2723_v60, %s2338_s22  ;;  %4143 = vst [vmem:[#allocation32_spill] sm:$0xff] %v2744_v56  ;;  %v2759_v60 = vld [vmem:[%s2384_s20 + $0x38] sm:$0xff] }
  0xb4   : > { %v2731_v48 = vpop.permute.xlu2 %599  ;;  %v2733_v49 = vpop.permute.xlu1 %579  ;;  %4147 = vst [vmem:[#allocation36_spill] sm:$0xff] %v2759_v60 }
  0xb5   : > { %4138 = vst [vmem:[#allocation27_spill] sm:$0xff] %v2731_v48  ;;  %v2735_v55 = vpop.permute.xlu0 %577 }
  0xb6   : > { %4139 = vst [vmem:[#allocation28_spill] sm:$0xff] %v2733_v49 }
  0xb7   : > { %4140 = vst [vmem:[#allocation29_spill] sm:$0xff] %v2735_v55 }
  0xb8   : > { %4148 = vst [vmem:[#allocation37_spill] sm:$0xff] %v2762_v30 }
  0xba   : > { %799 = vrot.lane.b32.xlu2 %v2744_v56, %s2339_s23  ;;  %797 = vrot.lane.b32.xlu1 %v2741_v35, %s2339_s23 }
  0xbb   : > { %731 = vrot.lane.b32.xlu0 %v2738_v50, %s2338_s22  ;;  %v2786_v50 = vld [vmem:[%s2384_s20 + $0x50] sm:$0xff] }
  0xbc   : > { %v2752_v48 = vpop.permute.xlu2 %669  ;;  %v2754_v49 = vpop.permute.xlu1 %585  ;;  %4155 = vst [vmem:[#allocation44_spill] sm:$0xff] %v2786_v50 }
  0xbd   : > { %4144 = vst [vmem:[#allocation33_spill] sm:$0xff] %v2752_v48  ;;  %v2756_v55 = vpop.permute.xlu0 %583 }
  0xbe   : > { %4145 = vst [vmem:[#allocation34_spill] sm:$0xff] %v2754_v49  ;;  %v2783_v49 = vld [vmem:[%s2384_s20 + $0x68] sm:$0xff] }
  0xbf   : > { %4146 = vst [vmem:[#allocation35_spill] sm:$0xff] %v2756_v55  ;;  %v2780_v55 = vld [vmem:[%s2384_s20 + $0x60] sm:$0xff] }
  0xc0   : > { %4153 = vst [vmem:[#allocation42_spill] sm:$0xff] %v2780_v55 }
  0xc1   : > { %4154 = vst [vmem:[#allocation43_spill] sm:$0xff] %v2783_v49 }
  0xc2   : > { %805 = vrot.lane.b32.xlu2 %v2762_v30, %s2339_s23  ;;  %803 = vrot.lane.b32.xlu1 %v2759_v60, %s2339_s23 }
  0xc3   : > { %801 = vrot.lane.b32.xlu0 %v2765_v62, %s2339_s23 }
  0xc4   : > { %v2773_v48 = vpop.permute.xlu2 %675  ;;  %v2775_v35 = vpop.permute.xlu1 %591 }
  0xc5   : > { %4150 = vst [vmem:[#allocation39_spill] sm:$0xff] %v2773_v48  ;;  %v2777_v56 = vpop.permute.xlu0 %589  ;;  %v2805_v48 = vld [vmem:[%s2384_s20 + $0x78] sm:$0xff] }
  0xc6   : > { %4151 = vst [vmem:[#allocation40_spill] sm:$0xff] %v2775_v35  ;;  %v2802_v35 = vld [vmem:[%s2384_s20 + $0x90] sm:$0xff] }
  0xc7   : > { %4152 = vst [vmem:[#allocation41_spill] sm:$0xff] %v2777_v56  ;;  %v230_v56 = vld [vmem:[%s2384_s20 + $0x80] sm:$0xff] }
  0xc8   : > { %4159 = vst [vmem:[#allocation48_spill] sm:$0xff] %v2802_v35 }
  0xc9   : > { %4160 = vst [vmem:[#allocation49_spill] sm:$0xff] %v2805_v48 }
  0xca   : > { %811 = vrot.lane.b32.xlu2 %v2783_v49, %s2339_s23  ;;  %809 = vrot.lane.b32.xlu1 %v2780_v55, %s2339_s23 }
  0xcb   : > { %807 = vrot.lane.b32.xlu0 %v2786_v50, %s2339_s23  ;;  %v2823_v50 = vld [vmem:[%s2384_s20 + $0x98] sm:$0xff] }
  0xcc   : > { %v2794_v60 = vpop.permute.xlu2 %681  ;;  %v2796_v62 = vpop.permute.xlu1 %597  ;;  %4165 = vst [vmem:[#allocation54_spill] sm:$0xff] %v2823_v50 }
  0xcd   : > { %4156 = vst [vmem:[#allocation45_spill] sm:$0xff] %v2794_v60  ;;  %v2798_v30 = vpop.permute.xlu0 %595 }
  0xce   : > { %4157 = vst [vmem:[#allocation46_spill] sm:$0xff] %v2796_v62  ;;  %v2820_v62 = vld [vmem:[%s2384_s20 + $0xb0] sm:$0xff] }
  0xcf   : > { %4158 = vst [vmem:[#allocation47_spill] sm:$0xff] %v2798_v30  ;;  %v233_v30 = vld [vmem:[%s2384_s20 + $0xa8] sm:$0xff] }
  0xd0   : > { %4164 = vst [vmem:[#allocation53_spill] sm:$0xff] %v2820_v62 }
  0xd2   : > { %817 = vrot.lane.b32.xlu2 %v2802_v35, %s2339_s23  ;;  %815 = vrot.lane.b32.xlu1 %v230_v56, %s2339_s23  ;;  %v2837_v35 = vld [vmem:[%s2384_s20 + $0xc8] sm:$0xff] }
  0xd3   : > { %813 = vrot.lane.b32.xlu0 %v2805_v48, %s2339_s23  ;;  %4169 = vst [vmem:[#allocation58_spill] sm:$0xff] %v2837_v35  ;;  %v2843_v48 = vld [vmem:[%s2384_s20 + $0xc0] sm:$0xff] }
  0xd4   : > { %v2812_v55 = vpop.permute.xlu2 %687  ;;  %v2814_v60 = vpop.permute.xlu1 %603  ;;  %4171 = vst [vmem:[#allocation60_spill] sm:$0xff] %v2843_v48 }
  0xd5   : > { %4161 = vst [vmem:[#allocation50_spill] sm:$0xff] %v2812_v55  ;;  %v2816_v49 = vpop.permute.xlu0 %601 }
  0xd6   : > { %4162 = vst [vmem:[#allocation51_spill] sm:$0xff] %v2814_v60 }
  0xd7   : > { %4163 = vst [vmem:[#allocation52_spill] sm:$0xff] %v2816_v49  ;;  %v2840_v49 = vld [vmem:[%s2384_s20 + $0xd8] sm:$0xff] }
  0xd8   : > { %4170 = vst [vmem:[#allocation59_spill] sm:$0xff] %v2840_v49 }
  0xda   : > { %823 = vrot.lane.b32.xlu2 %v2820_v62, %s2339_s23  ;;  %821 = vrot.lane.b32.xlu1 %v233_v30, %s2339_s23  ;;  %v2864_v62 = vld [vmem:[%s2384_s20 + $0xe0] sm:$0xff] }
  0xdb   : > { %819 = vrot.lane.b32.xlu0 %v2823_v50, %s2339_s23  ;;  %v2861_v50 = vld [vmem:[%s2384_s20 + $0xf8] sm:$0xff]  ;;  %4177 = vst [vmem:[#allocation66_spill] sm:$0xff] %v2864_v62 }
  0xdc   : > { %v2830_v56 = vpop.permute.xlu2 %693  ;;  %v2832_v60 = vpop.permute.xlu1 %673  ;;  %4176 = vst [vmem:[#allocation65_spill] sm:$0xff] %v2861_v50 }
  0xdd   : > { %4166 = vst [vmem:[#allocation55_spill] sm:$0xff] %v2830_v56  ;;  %v2834_v55 = vpop.permute.xlu0 %671 }
  0xde   : > { %4167 = vst [vmem:[#allocation56_spill] sm:$0xff] %v2832_v60  ;;  %v2858_v60 = vld [vmem:[%s2384_s20 + $0xf0] sm:$0xff] }
  0xdf   : > { %4168 = vst [vmem:[#allocation57_spill] sm:$0xff] %v2834_v55 }
  0xe0   : > { %4175 = vst [vmem:[#allocation64_spill] sm:$0xff] %v2858_v60 }
  0xe2   : > { %829 = vrot.lane.b32.xlu2 %v2840_v49, %s2339_s23  ;;  %827 = vrot.lane.b32.xlu1 %v2837_v35, %s2339_s23  ;;  %v2879_v49 = vld [vmem:[%s2384_s20 + $0x110] sm:$0xff] }
  0xe3   : > { %825 = vrot.lane.b32.xlu0 %v2843_v48, %s2339_s23  ;;  %4181 = vst [vmem:[#allocation70_spill] sm:$0xff] %v2879_v49  ;;  %v2885_v48 = vld [vmem:[%s2384_s20 + $0x108] sm:$0xff] }
  0xe4   : > { %v2851_v30 = vpop.permute.xlu2 %699  ;;  %v2853_v56 = vpop.permute.xlu1 %679  ;;  %4183 = vst [vmem:[#allocation72_spill] sm:$0xff] %v2885_v48 }
  0xe5   : > { %4172 = vst [vmem:[#allocation61_spill] sm:$0xff] %v2851_v30  ;;  %v2855_v55 = vpop.permute.xlu0 %677  ;;  %v2882_v30 = vld [vmem:[%s2384_s20 + $0x120] sm:$0xff] }
  0xe6   : > { %4173 = vst [vmem:[#allocation62_spill] sm:$0xff] %v2853_v56 }
  0xe7   : > { %4174 = vst [vmem:[#allocation63_spill] sm:$0xff] %v2855_v55 }
  0xe8   : > { %4182 = vst [vmem:[#allocation71_spill] sm:$0xff] %v2882_v30 }
  0xea   : > { %835 = vrot.lane.b32.xlu2 %v2861_v50, %s2339_s23  ;;  %833 = vrot.lane.b32.xlu1 %v2858_v60, %s2339_s23  ;;  %v2906_v50 = vld [vmem:[%s2384_s20 + $0x128] sm:$0xff] }
  0xeb   : > { %831 = vrot.lane.b32.xlu0 %v2864_v62, %s2339_s23  ;;  %v2903_v62 = vld [vmem:[%s2384_s20 + $0x140] sm:$0xff]  ;;  %4189 = vst [vmem:[#allocation78_spill] sm:$0xff] %v2906_v50 }
  0xec   : > { %v2872_v56 = vpop.permute.xlu2 %705  ;;  %v2874_v55 = vpop.permute.xlu1 %685  ;;  %4188 = vst [vmem:[#allocation77_spill] sm:$0xff] %v2903_v62 }
  0xed   : > { %4178 = vst [vmem:[#allocation67_spill] sm:$0xff] %v2872_v56  ;;  %v2876_v35 = vpop.permute.xlu0 %683  ;;  %v2900_v56 = vld [vmem:[%s2384_s20 + $0x138] sm:$0xff] }
  0xee   : > { %4179 = vst [vmem:[#allocation68_spill] sm:$0xff] %v2874_v55 }
  0xef   : > { %4180 = vst [vmem:[#allocation69_spill] sm:$0xff] %v2876_v35 }
  0xf0   : > { %4187 = vst [vmem:[#allocation76_spill] sm:$0xff] %v2900_v56 }
  0xf2   : > { %841 = vrot.lane.b32.xlu2 %v2882_v30, %s2339_s23  ;;  %839 = vrot.lane.b32.xlu1 %v2879_v49, %s2339_s23  ;;  %v2921_v30 = vld [vmem:[%s2384_s20 + $0x158] sm:$0xff] }
  0xf3   : > { %837 = vrot.lane.b32.xlu0 %v2885_v48, %s2339_s23  ;;  %4193 = vst [vmem:[#allocation82_spill] sm:$0xff] %v2921_v30  ;;  %v2927_v48 = vld [vmem:[%s2384_s20 + $0x150] sm:$0xff] }
  0xf4   : > { %v2893_v55 = vpop.permute.xlu2 %711  ;;  %v2895_v35 = vpop.permute.xlu1 %691 }
  0xf5   : > { %4184 = vst [vmem:[#allocation73_spill] sm:$0xff] %v2893_v55  ;;  %v2897_v60 = vpop.permute.xlu0 %689  ;;  %v2924_v55 = vld [vmem:[%s2384_s20 + $0x168] sm:$0xff] }
  0xf6   : > { %4185 = vst [vmem:[#allocation74_spill] sm:$0xff] %v2895_v35 }
  0xf7   : > { %4186 = vst [vmem:[#allocation75_spill] sm:$0xff] %v2897_v60 }
  0xf8   : > { %4194 = vst [vmem:[#allocation83_spill] sm:$0xff] %v2924_v55 }
  0xfa   : > { %847 = vrot.lane.b32.xlu2 %v2903_v62, %s2339_s23  ;;  %845 = vrot.lane.b32.xlu1 %v2900_v56, %s2339_s23  ;;  %v2942_v62 = vld [vmem:[%s2384_s20 + $0x188] sm:$0xff] }
  0xfb   : > { %843 = vrot.lane.b32.xlu0 %v2906_v50, %s2339_s23  ;;  %4196 = vst [vmem:[#allocation85_spill] sm:$0xff] %v2942_v62  ;;  %v2948_v50 = vld [vmem:[%s2384_s20 + $0x170] sm:$0xff] }
  0xfc   : > { %v2914_v35 = vpop.permute.xlu2 %717  ;;  %v2916_v60 = vpop.permute.xlu1 %697  ;;  %4198 = vst [vmem:[#allocation87_spill] sm:$0xff] %v2948_v50 }
  0xfd   : > { %4190 = vst [vmem:[#allocation79_spill] sm:$0xff] %v2914_v35  ;;  %v2918_v49 = vpop.permute.xlu0 %695  ;;  %v2945_v35 = vld [vmem:[%s2384_s20 + $0x180] sm:$0xff] }
  0xfe   : > { %4191 = vst [vmem:[#allocation80_spill] sm:$0xff] %v2916_v60 }
  0xff   : > { %4192 = vst [vmem:[#allocation81_spill] sm:$0xff] %v2918_v49 }
 0x100   : > { %4197 = vst [vmem:[#allocation86_spill] sm:$0xff] %v2945_v35 }
 0x102   : > { %853 = vrot.lane.b32.xlu2 %v2924_v55, %s2339_s23  ;;  %851 = vrot.lane.b32.xlu1 %v2921_v30, %s2339_s23 }
 0x103   : > { %849 = vrot.lane.b32.xlu0 %v2927_v48, %s2339_s23 }
 0x104   : > { %v2935_v56 = vpop.permute.xlu2 %723  ;;  %v2937_v60 = vpop.permute.xlu1 %703 }
 0x105   : > { %4195 = vst [vmem:[#allocation84_spill] sm:$0xff] %v2937_v60  ;;  %v2939_v49 = vpop.permute.xlu0 %701 }
 0x10a   : > { %859 = vrot.lane.b32.xlu2 %v2942_v62, %s2339_s23  ;;  %857 = vrot.lane.b32.xlu1 %v2945_v35, %s2339_s23 }
 0x10b   : > { %855 = vrot.lane.b32.xlu0 %v2948_v50, %s2339_s23 }
 0x10c   : > { %v2956_v30 = vpop.permute.xlu2 %729  ;;  %v2958_v60 = vpop.permute.xlu1 %709 }
 0x10d   : > { %v2960_v55 = vpop.permute.xlu0 %707 }
 0x112   : > { %929 = vrot.lane.b32.xlu2 %v2387_v0, %s2340_s24  ;;  %927 = vrot.lane.b32.xlu1 %v2402_v4, %s2340_s24 }
 0x113   : > { %925 = vrot.lane.b32.xlu0 %v2390_v1, %s2340_s24 }
 0x114   : > { %v2968_v35 = vpop.permute.xlu2 %799  ;;  %v2970_v62 = vpop.permute.xlu1 %715 }
 0x115   : > { %v2972_v50 = vpop.permute.xlu0 %713 }
 0x11a   : > { %935 = vrot.lane.b32.xlu2 %v2414_v7, %s2340_s24  ;;  %933 = vrot.lane.b32.xlu1 %v2417_v8, %s2340_s24 }
 0x11b   : > { %931 = vrot.lane.b32.xlu0 %v2399_v3, %s2340_s24 }
 0x11c   : > { %v2980_v0 = vpop.permute.xlu2 %805  ;;  %v2982_v4 = vpop.permute.xlu1 %721 }
 0x11d   : > { %v2984_v1 = vpop.permute.xlu0 %719 }
 0x122   : > { %941 = vrot.lane.b32.xlu2 %v2429_v10, %s2340_s24  ;;  %939 = vrot.lane.b32.xlu1 %v2432_v11, %s2340_s24 }
 0x123   : > { %937 = vrot.lane.b32.xlu0 %v2411_v6, %s2340_s24 }
 0x124   : > { %v2992_v7 = vpop.permute.xlu2 %811  ;;  %v2994_v8 = vpop.permute.xlu1 %727 }
 0x125   : > { %v2996_v3 = vpop.permute.xlu0 %725 }
 0x12a   : > { %947 = vrot.lane.b32.xlu2 %v2444_v13, %s2340_s24  ;;  %945 = vrot.lane.b32.xlu1 %v2447_v14, %s2340_s24 }
 0x12b   : > { %943 = vrot.lane.b32.xlu0 %v2426_v9, %s2340_s24 }
 0x12c   : > { %v3004_v10 = vpop.permute.xlu2 %817  ;;  %v3006_v11 = vpop.permute.xlu1 %797 }
 0x12d   : > { %4199 = vst [vmem:[#allocation88_spill] sm:$0xff] %v3004_v10  ;;  %v3008_v6 = vpop.permute.xlu0 %731  ;;  %v3083_v10 = vld [vmem:[%s2384_s20 + $0x189] sm:$0xff] }
 0x12e   : > { %4200 = vst [vmem:[#allocation89_spill] sm:$0xff] %v3008_v6  ;;  %v4230_v6 = vld [vmem:[#allocation72_spill] sm:$0xff] }
 0x132   : > { %953 = vrot.lane.b32.xlu2 %v2459_v16, %s2340_s24  ;;  %951 = vrot.lane.b32.xlu1 %v2462_v17, %s2340_s24 }
 0x133   : > { %949 = vrot.lane.b32.xlu0 %v2441_v12, %s2340_s24 }
 0x134   : > { %v3016_v13 = vpop.permute.xlu2 %823  ;;  %v3018_v14 = vpop.permute.xlu1 %803 }
 0x135   : > { %4201 = vst [vmem:[#allocation90_spill] sm:$0xff] %v3016_v13  ;;  %v3020_v9 = vpop.permute.xlu0 %801 }
 0x13a   : > { %959 = vrot.lane.b32.xlu2 %v2474_v19, %s2340_s24  ;;  %957 = vrot.lane.b32.xlu1 %v2477_v20, %s2340_s24 }
 0x13b   : > { %955 = vrot.lane.b32.xlu0 %v2456_v15, %s2340_s24 }
 0x13c   : > { %v3028_v16 = vpop.permute.xlu2 %829  ;;  %v3030_v17 = vpop.permute.xlu1 %809 }
 0x13d   : > { %4202 = vst [vmem:[#allocation91_spill] sm:$0xff] %v3030_v17  ;;  %v3032_v12 = vpop.permute.xlu0 %807  ;;  %v4239_v17 = vld [vmem:[#allocation78_spill] sm:$0xff] }
 0x13e   : > { %4203 = vst [vmem:[#allocation92_spill] sm:$0xff] %v3032_v12  ;;  %v4236_v12 = vld [vmem:[#allocation32_spill] sm:$0xff] }
 0x142   : > { %965 = vrot.lane.b32.xlu2 %v2489_v22, %s2340_s24  ;;  %963 = vrot.lane.b32.xlu1 %v2492_v23, %s2340_s24 }
 0x143   : > { %961 = vrot.lane.b32.xlu0 %v2471_v18, %s2340_s24 }
 0x144   : > { %v3040_v19 = vpop.permute.xlu2 %835  ;;  %v3042_v20 = vpop.permute.xlu1 %815 }
 0x145   : > { %4204 = vst [vmem:[#allocation93_spill] sm:$0xff] %v3042_v20  ;;  %v3044_v15 = vpop.permute.xlu0 %813  ;;  %v4233_v20 = vld [vmem:[#allocation73_spill] sm:$0xff] }
 0x146   : > { %4205 = vst [vmem:[#allocation94_spill] sm:$0xff] %v3044_v15 }
 0x14a   : > { %971 = vrot.lane.b32.xlu2 %v2504_v25, %s2340_s24  ;;  %969 = vrot.lane.b32.xlu1 %v2507_v26, %s2340_s24 }
 0x14b   : > { %967 = vrot.lane.b32.xlu0 %v2486_v21, %s2340_s24 }
 0x14c   : > { %v3052_v22 = vpop.permute.xlu2 %841  ;;  %v3054_v18 = vpop.permute.xlu1 %821 }
 0x14d   : > { %4206 = vst [vmem:[#allocation95_spill] sm:$0xff] %v3054_v18  ;;  %v3056_v23 = vpop.permute.xlu0 %819 }
 0x14e   : > { %4207 = vst [vmem:[#allocation96_spill] sm:$0xff] %v3056_v23  ;;  %v3086_v23 = vld [vmem:[%s2384_s20 + $0x181] sm:$0xff] }
 0x152   : > { %977 = vrot.lane.b32.xlu2 %v2519_v28, %s2340_s24  ;;  %975 = vrot.lane.b32.xlu1 %v2522_v29, %s2340_s24 }
 0x153   : > { %973 = vrot.lane.b32.xlu0 %v2501_v24, %s2340_s24 }
 0x154   : > { %v3064_v25 = vpop.permute.xlu2 %847  ;;  %v3066_v21 = vpop.permute.xlu1 %827 }
 0x155   : > { %v3068_v26 = vpop.permute.xlu0 %825 }
 0x156   : > { %4208 = vst [vmem:[#allocation97_spill] sm:$0xff] %v3068_v26  ;;  %v4224_v26 = vld [vmem:[#allocation53_spill] sm:$0xff] }
 0x15a   : > { %983 = vrot.lane.b32.xlu2 %v2532_v31, %s2340_s24  ;;  %981 = vrot.lane.b32.xlu1 %v2535_v32, %s2340_s24 }
 0x15b   : > { %979 = vrot.lane.b32.xlu0 %v2516_v27, %s2340_s24 }
 0x15c   : > { %v3076_v28 = vpop.permute.xlu2 %853  ;;  %v3078_v29 = vpop.permute.xlu1 %833 }
 0x15d   : > { %v3080_v24 = vpop.permute.xlu0 %831 }
 0x162   : > { %1053 = vrot.lane.b32.xlu2 %v2546_v34, %s2341_s25  ;;  %987 = vrot.lane.b32.xlu1 %v3083_v10, %s2340_s24 }
 0x163   : > { %985 = vrot.lane.b32.xlu0 %v3086_v23, %s2340_s24 }
 0x164   : > { %v3094_v27 = vpop.permute.xlu2 %859  ;;  %v3096_v31 = vpop.permute.xlu1 %839 }
 0x165   : > { %4209 = vst [vmem:[#allocation98_spill] sm:$0xff] %v3094_v27  ;;  %v3098_v32 = vpop.permute.xlu0 %837 }
 0x16a   : > { %1059 = vrot.lane.b32.xlu2 %v2560_v38, %s2341_s25  ;;  %1057 = vrot.lane.b32.xlu1 %v2563_v39, %s2341_s25 }
 0x16b   : > { %1055 = vrot.lane.b32.xlu0 %v2543_v33, %s2341_s25 }
 0x16c   : > { %v3106_v34 = vpop.permute.xlu2 %929  ;;  %v3108_v18 = vpop.permute.xlu1 %845 }
 0x16d   : > { %v3110_v13 = vpop.permute.xlu0 %843 }
 0x172   : > { %1065 = vrot.lane.b32.xlu2 %v2577_v42, %s2341_s25  ;;  %1063 = vrot.lane.b32.xlu1 %v2580_v43, %s2341_s25 }
 0x173   : > { %1061 = vrot.lane.b32.xlu0 %v2557_v37, %s2341_s25 }
 0x174   : > { %v3118_v38 = vpop.permute.xlu2 %935  ;;  %v3120_v39 = vpop.permute.xlu1 %851 }
 0x175   : > { %4210 = vst [vmem:[#allocation99_spill] sm:$0xff] %v3118_v38  ;;  %v3122_v33 = vpop.permute.xlu0 %849 }
 0x17a   : > { %1071 = vrot.lane.b32.xlu2 %v2594_v46, %s2341_s25  ;;  %1069 = vrot.lane.b32.xlu1 %v2597_v47, %s2341_s25 }
 0x17b   : > { %1067 = vrot.lane.b32.xlu0 %v2574_v41, %s2341_s25 }
 0x17c   : > { %v3130_v42 = vpop.permute.xlu2 %941  ;;  %v3132_v43 = vpop.permute.xlu1 %857 }
 0x17d   : > { %4211 = vst [vmem:[#allocation100_spill] sm:$0xff] %v3130_v42  ;;  %v3134_v37 = vpop.permute.xlu0 %855 }
 0x182   : > { %1077 = vrot.lane.b32.xlu2 %v2615_v52, %s2341_s25  ;;  %1075 = vrot.lane.b32.xlu1 %v2618_v53, %s2341_s25 }
 0x183   : > { %1073 = vrot.lane.b32.xlu0 %v2591_v45, %s2341_s25 }
 0x184   : > { %v3142_v46 = vpop.permute.xlu2 %947  ;;  %v3144_v47 = vpop.permute.xlu1 %927 }
 0x185   : > { %4212 = vst [vmem:[#allocation101_spill] sm:$0xff] %v3142_v46  ;;  %v3146_v41 = vpop.permute.xlu0 %925  ;;  %v4219_v46 = vld [vmem:[#allocation22_spill] sm:$0xff] }
 0x18a   : > { %1083 = vrot.lane.b32.xlu2 %v2636_v58, %s2341_s25  ;;  %1081 = vrot.lane.b32.xlu1 %v2639_v59, %s2341_s25 }
 0x18b   : > { %1079 = vrot.lane.b32.xlu0 %v2612_v51, %s2341_s25 }
 0x18c   : > { %v3154_v52 = vpop.permute.xlu2 %953  ;;  %v3156_v53 = vpop.permute.xlu1 %933 }
 0x18d   : > { %4213 = vst [vmem:[#allocation102_spill] sm:$0xff] %v3154_v52  ;;  %v3158_v45 = vpop.permute.xlu0 %931 }
 0x192   : > { %1089 = vrot.lane.b32.xlu2 %v2657_v2, %s2341_s25  ;;  %1087 = vrot.lane.b32.xlu1 %v2660_v5, %s2341_s25 }
 0x193   : > { %1085 = vrot.lane.b32.xlu0 %v2633_v57, %s2341_s25 }
 0x194   : > { %v3166_v58 = vpop.permute.xlu2 %959  ;;  %v3168_v59 = vpop.permute.xlu1 %939 }
 0x195   : > { %v3170_v51 = vpop.permute.xlu0 %937 }
 0x196   : > { %4214 = vst [vmem:[#allocation103_spill] sm:$0xff] %v3170_v51  ;;  %v4235_v51 = vld [vmem:[#allocation9_spill] sm:$0xff] }
 0x19a   : > { %1095 = vrot.lane.b32.xlu2 %v2678_v44, %s2341_s25  ;;  %1093 = vrot.lane.b32.xlu1 %v2681_v40, %s2341_s25 }
 0x19b   : > { %1091 = vrot.lane.b32.xlu0 %v2654_v63, %s2341_s25 }
 0x19c   : > { %v3178_v2 = vpop.permute.xlu2 %965  ;;  %v3180_v5 = vpop.permute.xlu1 %945 }
 0x19d   : > { %4215 = vst [vmem:[#allocation104_spill] sm:$0xff] %v3180_v5  ;;  %v3182_v57 = vpop.permute.xlu0 %943  ;;  %v4220_v5 = vld [vmem:[#allocation60_spill] sm:$0xff] }
 0x19e   : > { %4216 = vst [vmem:[#allocation105_spill] sm:$0xff] %v3182_v57  ;;  %v1550_v52 = vsel %vm1533_vm0, %v4220_v5, %v4219_v46  ;;  %v4226_v46 = vld [vmem:[#allocation61_spill] sm:$0xff] }
 0x1a2   : > { %1101 = vrot.lane.b32.xlu2 %v2699_v61, %s2341_s25  ;;  %1099 = vrot.lane.b32.xlu1 %v2702_v36, %s2341_s25  ;;  %v4221_v61 = vld [vmem:[#allocation25_spill] sm:$0xff]  ;;  %v4222_v36 = vld [vmem:[#allocation26_spill] sm:$0xff] }
 0x1a3   : > { %1097 = vrot.lane.b32.xlu0 %v2675_v54, %s2341_s25  ;;  %v4223_v54 = vld [vmem:[#allocation23_spill] sm:$0xff] }
 0x1a4   : > { %v3190_v44 = vpop.permute.xlu2 %971  ;;  %v3192_v40 = vpop.permute.xlu1 %951  ;;  %v1549_v27 = vsel %vm1533_vm0, %v4224_v26, %v4223_v54 }
 0x1a5   : > { %4217 = vst [vmem:[#allocation106_spill] sm:$0xff] %v3192_v40  ;;  %v3194_v63 = vpop.permute.xlu0 %949  ;;  %v4225_v40 = vld [vmem:[#allocation20_spill] sm:$0xff]  ;;  %v1582_v5 = vsel %vm1566_vm1, %v1549_v27, %v4226_v46  ;;  %v3225_v27 = vld [vmem:[%s2384_s20 + $0x182] sm:$0xff] }
 0x1a6   : > { %4218 = vst [vmem:[#allocation107_spill] sm:$0xff] %v3194_v63  ;;  %v1583_v63 = vsel %vm1566_vm1, %v1550_v52, %v2939_v49  ;;  %v1615_v49 = vsel %vm1599_vm2, %v1582_v5, %v3066_v21 }
 0x1aa   : > { %1107 = vrot.lane.b32.xlu2 %v4221_v61, %s2341_s25  ;;  %1105 = vrot.lane.b32.xlu1 %v4222_v36, %s2341_s25  ;;  %v1616_v61 = vsel %vm1599_vm2, %v1583_v63, %v3028_v16  ;;  %v4227_v16 = vld [vmem:[#allocation30_spill] sm:$0xff]  ;;  %v4228_v63 = vld [vmem:[#allocation24_spill] sm:$0xff] }
 0x1ab   : > { %1103 = vrot.lane.b32.xlu0 %v4225_v40, %s2341_s25 }
 0x1ac   : > { %v3214_v36 = vpop.permute.xlu2 %977  ;;  %v958_v26 = vpop.permute.xlu1 %957 }
 0x1ad   : > { %v3219_v52 = vsel %vm1632_vm3, %v1616_v61, %v958_v26  ;;  %v956_v40 = vpop.permute.xlu0 %955  ;;  %v2175_v61 = vld [vmem:[%s2384_s20 + $0x38] sm:$0xff]  ;;  %v2174_v26 = vld [vmem:[%s2384_s20 + $0x30] sm:$0xff] }
 0x1ae   : > { %v3222_v54 = vsel %vm1632_vm3, %v1615_v49, %v956_v40  ;;  %v3242_v49 = vld [vmem:[%s2384_s20 + $0x18a] sm:$0xff]  ;;  %v4229_v40 = vld [vmem:[#allocation34_spill] sm:$0xff] }
 0x1af   : > { %v1556_v42 = vsel %vm1533_vm0, %v4230_v6, %v4229_v40 }
 0x1b0   : > { %v1589_v15 = vsel %vm1566_vm1, %v1556_v42, %v2972_v50  ;;  %v2178_v42 = vld [vmem:[%s2384_s20 + $0x60] sm:$0xff] }
 0x1b1   : > { %v1622_v6 = vsel %vm1599_vm2, %v1589_v15, %v3052_v22  ;;  %v4238_v22 = vld [vmem:[#allocation40_spill] sm:$0xff] }
 0x1b2   : > { %1113 = vrot.lane.b32.xlu2 %v3225_v27, %s2341_s25  ;;  %1111 = vrot.lane.b32.xlu1 %v4227_v16, %s2341_s25  ;;  %v4231_v16 = vld [vmem:[#allocation35_spill] sm:$0xff] }
 0x1b3   : > { %1109 = vrot.lane.b32.xlu0 %v4228_v63, %s2341_s25  ;;  %v4232_v63 = vld [vmem:[#allocation65_spill] sm:$0xff] }
 0x1b4   : > { %v3233_v46 = vpop.permute.xlu2 %983  ;;  %v3235_v21 = vpop.permute.xlu1 %963  ;;  %v1555_v57 = vsel %vm1533_vm0, %v4232_v63, %v4231_v16 }
 0x1b5   : > { %v3237_v5 = vpop.permute.xlu0 %961  ;;  %v1588_v38 = vsel %vm1566_vm1, %v1555_v57, %v4233_v20  ;;  %v1537_v20 = vsel %vm1533_vm0, %v4236_v12, %v4235_v51  ;;  %v4237_v57 = vld [vmem:[#allocation39_spill] sm:$0xff] }
 0x1b6   : > { %v1570_v15 = vsel %vm1566_vm1, %v1537_v20, %v4237_v57 }
 0x1b7   : > { %v1603_v51 = vsel %vm1599_vm2, %v1570_v15, %v3018_v14 }
 0x1b8   : > { %v1636_v20 = vsel %vm1632_vm3, %v1603_v51, %v3158_v45 }
 0x1ba   : > { %1183 = vrot.lane.b32.xlu2 %v2175_v61, %s2342_s26  ;;  %1181 = vrot.lane.b32.xlu1 %v2174_v26, %s2342_s26  ;;  %v1621_v26 = vsel %vm1599_vm2, %v1588_v38, %v3096_v31  ;;  %v4240_v31 = vld [vmem:[#allocation44_spill] sm:$0xff]  ;;  %v4241_v38 = vld [vmem:[#allocation41_spill] sm:$0xff] }
 0x1bb   : > { %1115 = vrot.lane.b32.xlu0 %v3242_v49, %s2341_s25 }
 0x1bc   : > { %v3260_v40 = vpop.permute.xlu2 %1053  ;;  %v970_v61 = vpop.permute.xlu1 %969 }
 0x1bd   : > { %4234 = vst [vmem:[#allocation22_spill] sm:$0xff] %v3260_v40  ;;  %v3265_v16 = vsel %vm1632_vm3, %v1622_v6, %v970_v61  ;;  %v968_v63 = vpop.permute.xlu0 %967  ;;  %v1559_v40 = vsel %vm1533_vm0, %v4239_v17, %v4238_v22  ;;  %v4242_v6 = vld [vmem:[#allocation71_spill] sm:$0xff] }
 0x1be   : > { %v3268_v50 = vsel %vm1632_vm3, %v1621_v26, %v968_v63  ;;  %v1558_v61 = vsel %vm1533_vm0, %v4242_v6, %v4241_v38  ;;  %v1592_v12 = vsel %vm1566_vm1, %v1559_v40, %v2984_v1  ;;  %v4243_v26 = vld [vmem:[#allocation37_spill] sm:$0xff]  ;;  %v4244_v17 = vld [vmem:[#allocation79_spill] sm:$0xff]  ;;  %v4245_v6 = vld [vmem:[#allocation46_spill] sm:$0xff] }
 0x1bf   : > { %v1591_v63 = vsel %vm1566_vm1, %v1558_v61, %v4244_v17  ;;  %v1562_v45 = vsel %vm1533_vm0, %v2927_v48, %v4245_v6  ;;  %v4246_v61 = vld [vmem:[#allocation49_spill] sm:$0xff]  ;;  %v4253_v6 = vld [vmem:[#allocation83_spill] sm:$0xff] }
 0x1c0   : > { %v1624_v1 = vsel %vm1599_vm2, %v1591_v63, %v3108_v18  ;;  %v4247_v18 = vld [vmem:[#allocation47_spill] sm:$0xff]  ;;  %v1595_v17 = vsel %vm1566_vm1, %v1562_v45, %v2996_v3 }
 0x1c1   : > { %v4249_v63 = vld [vmem:[#allocation43_spill] sm:$0xff]  ;;  %v1628_v48 = vsel %vm1599_vm2, %v1595_v17, %v3076_v28  ;;  %v4251_v28 = vld [vmem:[#allocation54_spill] sm:$0xff] }
 0x1c2   : > { %1189 = vrot.lane.b32.xlu2 %v2178_v42, %s2342_s26  ;;  %1187 = vrot.lane.b32.xlu1 %v4240_v31, %s2342_s26  ;;  %v1625_v42 = vsel %vm1599_vm2, %v1592_v12, %v3064_v25  ;;  %v2181_v25 = vld [vmem:[%s2384_s20 + $0x80] sm:$0xff]  ;;  %v4248_v12 = vld [vmem:[#allocation77_spill] sm:$0xff] }
 0x1c3   : > { %1185 = vrot.lane.b32.xlu0 %v4243_v26, %s2342_s26  ;;  %v1561_v51 = vsel %vm1533_vm0, %v4248_v12, %v4247_v18 }
 0x1c4   : > { %v1060_v57 = vpop.permute.xlu2 %1059  ;;  %v976_v22 = vpop.permute.xlu1 %975 }
 0x1c5   : > { %v3300_v14 = vsel %vm1665_vm4, %v1636_v20, %v1060_v57  ;;  %v3303_v40 = vsel %vm1632_vm3, %v1625_v42, %v976_v22  ;;  %v974_v15 = vpop.permute.xlu0 %973  ;;  %v1594_v42 = vsel %vm1566_vm1, %v1561_v51, %v2935_v56  ;;  %v4250_v56 = vld [vmem:[#allocation66_spill] sm:$0xff] }
 0x1c6   : > { %v3306_v38 = vsel %vm1632_vm3, %v1624_v1, %v974_v15  ;;  %v1627_v22 = vsel %vm1599_vm2, %v1594_v42, %v3120_v39  ;;  %v4254_v39 = vld [vmem:[#allocation48_spill] sm:$0xff] }
 0x1ca   : > { %1195 = vrot.lane.b32.xlu2 %v2181_v25, %s2342_s26  ;;  %1193 = vrot.lane.b32.xlu1 %v4246_v61, %s2342_s26  ;;  %v4252_v25 = vld [vmem:[#allocation52_spill] sm:$0xff] }
 0x1cb   : > { %1191 = vrot.lane.b32.xlu0 %v4249_v63, %s2342_s26  ;;  %v1564_v45 = vsel %vm1533_vm0, %v4253_v6, %v4252_v25  ;;  %v4257_v25 = vld [vmem:[#allocation56_spill] sm:$0xff] }
 0x1cc   : > { %v3326_v20 = vpop.permute.xlu2 %1065  ;;  %v982_v57 = vpop.permute.xlu1 %981  ;;  %v1597_v61 = vsel %vm1566_vm1, %v1564_v45, %v2956_v30 }
 0x1cd   : > { %v3331_v3 = vsel %vm1632_vm3, %v1628_v48, %v982_v57  ;;  %v980_v1 = vpop.permute.xlu0 %979  ;;  %v1630_v51 = vsel %vm1599_vm2, %v1597_v61, %v3132_v43  ;;  %v2237_v48 = vld [vmem:[%s2384_s20 + $0x1a1] sm:$0xff] }
 0x1ce   : > { %v3334_v15 = vsel %vm1632_vm3, %v1627_v22, %v980_v1  ;;  %v2221_v57 = vld [vmem:[%s2384_s20 + $0xe1] sm:$0xff] }
 0x1cf   : > { %v2205_v22 = vld [vmem:[%s2384_s20 + $0x1a0] sm:$0xff] }
 0x1d0   : > { %v4255_v1 = vld [vmem:[#allocation6_spill] sm:$0xff] }
 0x1d2   : > { %1211 = vrot.lane.b32.xlu2 %v4250_v56, %s2342_s26  ;;  %1199 = vrot.lane.b32.xlu1 %v4251_v28, %s2342_s26  ;;  %v4256_v28 = vld [vmem:[#allocation31_spill] sm:$0xff] }
 0x1d3   : > { %1197 = vrot.lane.b32.xlu0 %v4254_v39, %s2342_s26  ;;  %v1536_v30 = vsel %vm1533_vm0, %v4256_v28, %v4255_v1 }
 0x1d4   : > { %v3347_v18 = vpop.permute.xlu2 %1071  ;;  %v3349_v12 = vpop.permute.xlu1 %987  ;;  %v1569_v6 = vsel %vm1566_vm1, %v1536_v30, %v4257_v25  ;;  %v2236_v30 = vld [vmem:[%s2384_s20 + $0x199] sm:$0xff] }
 0x1d5   : > { %v986_v17 = vpop.permute.xlu0 %985  ;;  %v1602_v43 = vsel %vm1599_vm2, %v1569_v6, %v3020_v9  ;;  %v4259_v9 = vld [vmem:[#allocation59_spill] sm:$0xff]  ;;  %v2220_v25 = vld [vmem:[%s2384_s20 + $0xd9] sm:$0xff] }
 0x1d6   : > { %v3354_v42 = vsel %vm1632_vm3, %v1630_v51, %v986_v17  ;;  %v1635_v45 = vsel %vm1632_vm3, %v1602_v43, %v3106_v34  ;;  %v2204_v6 = vld [vmem:[%s2384_s20 + $0x198] sm:$0xff] }
 0x1d7   : > { %v4260_v43 = vld [vmem:[#allocation29_spill] sm:$0xff] }
 0x1da   : > { %1371 = vrot.lane.b32.xlu2 %v2237_v48, %s2343_s27  ;;  %1339 = vrot.lane.b32.xlu1 %v2221_v57, %s2343_s27  ;;  %v2269_v48 = vld [vmem:[%s2384_s20 + $0x1a2] sm:$0xff] }
 0x1db   : > { %1243 = vrot.lane.b32.xlu0 %v2205_v22, %s2342_s26  ;;  %v2253_v57 = vld [vmem:[%s2384_s20 + $0xe2] sm:$0xff] }
 0x1dc   : > { %v3371_v39 = vpop.permute.xlu2 %1077  ;;  %v1058_v61 = vpop.permute.xlu1 %1057 }
 0x1dd   : > { %4258 = vst [vmem:[#allocation60_spill] sm:$0xff] %v3371_v39  ;;  %v3374_v51 = vsel %vm1665_vm4, %v1635_v45, %v1058_v61  ;;  %v3376_v17 = vpop.permute.xlu0 %1055  ;;  %v1552_v45 = vsel %vm1533_vm0, %v4259_v9, %v4260_v43  ;;  %v4261_v61 = vld [vmem:[#allocation67_spill] sm:$0xff] }
 0x1e2   : > { %1209 = vrot.lane.b32.xlu2 %v4259_v9, %s2342_s26  ;;  %1499 = vrot.lane.b32.xlu1 %v2269_v48, %s2344_s28  ;;  %v1585_v48 = vsel %vm1566_vm1, %v1552_v45, %v4261_v61  ;;  %v2268_v45 = vld [vmem:[%s2384_s20 + $0x19a] sm:$0xff] }
 0x1e3   : > { %1467 = vrot.lane.b32.xlu0 %v2253_v57, %s2344_s28 }
 0x1e4   : > { %v1084_v34 = vpop.permute.xlu2 %1083  ;;  %v3384_v22 = vpop.permute.xlu1 %1063 }
 0x1e5   : > { %v3388_v1 = vsel %vm1665_vm4, %v3222_v54, %v1084_v34  ;;  %v3390_v28 = vpop.permute.xlu0 %1061  ;;  %v1618_v54 = vsel %vm1599_vm2, %v1585_v48, %v3078_v29  ;;  %v2219_v48 = vld [vmem:[%s2384_s20 + $0xc9] sm:$0xff] }
 0x1e6   : > { %v1651_v57 = vsel %vm1632_vm3, %v1618_v54, %v3237_v5  ;;  %v4264_v54 = vld [vmem:[#allocation85_spill] sm:$0xff] }
 0x1ea   : > { %1369 = vrot.lane.b32.xlu2 %v2236_v30, %s2343_s27  ;;  %1337 = vrot.lane.b32.xlu1 %v2220_v25, %s2343_s27  ;;  %v2187_v30 = vld [vmem:[%s2384_s20 + $0xc8] sm:$0xff]  ;;  %v2252_v25 = vld [vmem:[%s2384_s20 + $0xda] sm:$0xff] }
 0x1eb   : > { %1241 = vrot.lane.b32.xlu0 %v2204_v6, %s2342_s26 }
 0x1ec   : > { %v1090_v34 = vpop.permute.xlu2 %1089  ;;  %v3407_v39 = vpop.permute.xlu1 %1069 }
 0x1ed   : > { %v3410_v9 = vsel %vm1665_vm4, %v1651_v57, %v1090_v34  ;;  %v3412_v43 = vpop.permute.xlu0 %1067 }
 0x1ee   : > { %4262 = vst [vmem:[#allocation25_spill] sm:$0xff] %v3410_v9  ;;  %v4267_v9 = vld [vmem:[#allocation58_spill] sm:$0xff] }
 0x1f2   : > { %1207 = vrot.lane.b32.xlu2 %v2187_v30, %s2342_s26  ;;  %1497 = vrot.lane.b32.xlu1 %v2268_v45, %s2344_s28  ;;  %v2186_v45 = vld [vmem:[%s2384_s20 + $0xc0] sm:$0xff] }
 0x1f3   : > { %1465 = vrot.lane.b32.xlu0 %v2252_v25, %s2344_s28  ;;  %v2251_v25 = vld [vmem:[%s2384_s20 + $0xca] sm:$0xff] }
 0x1f4   : > { %v1096_v29 = vpop.permute.xlu2 %1095  ;;  %v3420_v5 = vpop.permute.xlu1 %1075 }
 0x1f5   : > { %v3424_v6 = vsel %vm1665_vm4, %v3268_v50, %v1096_v29  ;;  %v3426_v61 = vpop.permute.xlu0 %1073  ;;  %v4266_v29 = vld [vmem:[#allocation11_spill] sm:$0xff] }
 0x1f6   : > { %4263 = vst [vmem:[#allocation26_spill] sm:$0xff] %v3424_v6 }
 0x1fa   : > { %1367 = vrot.lane.b32.xlu2 %v3083_v10, %s2343_s27  ;;  %1335 = vrot.lane.b32.xlu1 %v2219_v48, %s2343_s27  ;;  %v1551_v10 = vsel %vm1533_vm0, %v4267_v9, %v4266_v29  ;;  %v4268_v48 = vld [vmem:[#allocation84_spill] sm:$0xff] }
 0x1fb   : > { %1239 = vrot.lane.b32.xlu0 %v4264_v54, %s2342_s26  ;;  %v1584_v6 = vsel %vm1566_vm1, %v1551_v10, %v4268_v48  ;;  %v4271_v10 = vld [vmem:[#allocation28_spill] sm:$0xff] }
 0x1fc   : > { %v1102_v57 = vpop.permute.xlu2 %1101  ;;  %v3434_v34 = vpop.permute.xlu1 %1081  ;;  %v1553_v48 = vsel %vm1533_vm0, %v4250_v56, %v4271_v10  ;;  %v4275_v10 = vld [vmem:[#allocation70_spill] sm:$0xff] }
 0x1fd   : > { %v3438_v30 = vsel %vm1665_vm4, %v3306_v38, %v1102_v57  ;;  %v3440_v50 = vpop.permute.xlu0 %1079  ;;  %v1617_v38 = vsel %vm1599_vm2, %v1584_v6, %v3080_v24  ;;  %v2218_v24 = vld [vmem:[%s2384_s20 + $0xc1] sm:$0xff] }
 0x1fe   : > { %4265 = vst [vmem:[#allocation23_spill] sm:$0xff] %v3438_v30  ;;  %v1650_v54 = vsel %vm1632_vm3, %v1617_v38, %v3166_v58  ;;  %v4269_v6 = vld [vmem:[#allocation14_spill] sm:$0xff] }
 0x1ff   : > { %v4272_v38 = vld [vmem:[#allocation86_spill] sm:$0xff] }
 0x202   : > { %1205 = vrot.lane.b32.xlu2 %v2186_v45, %s2342_s26  ;;  %1495 = vrot.lane.b32.xlu1 %v3242_v49, %s2344_s28 }
 0x203   : > { %1463 = vrot.lane.b32.xlu0 %v2251_v25, %s2344_s28  ;;  %v4270_v25 = vld [vmem:[#allocation64_spill] sm:$0xff] }
 0x204   : > { %v1108_v57 = vpop.permute.xlu2 %1107  ;;  %v1088_v30 = vpop.permute.xlu1 %1087  ;;  %v1554_v58 = vsel %vm1533_vm0, %v4270_v25, %v4269_v6  ;;  %v2185_v6 = vld [vmem:[%s2384_s20 + $0xb0] sm:$0xff]  ;;  %v4273_v25 = vld [vmem:[#allocation10_spill] sm:$0xff] }
 0x205   : > { %v3459_v9 = vsel %vm1665_vm4, %v3334_v15, %v1108_v57  ;;  %v3462_v29 = vsel %vm1665_vm4, %v1650_v54, %v1088_v30  ;;  %v1086_v45 = vpop.permute.xlu0 %1085  ;;  %v1587_v15 = vsel %vm1566_vm1, %v1554_v58, %v2958_v60  ;;  %v220_v57 = vld [vmem:[%s2384_s20 + $0x8] sm:$0xff] }
 0x206   : > { %v3466_v49 = vsel %vm1665_vm4, %v3219_v52, %v1086_v45  ;;  %v1586_v52 = vsel %vm1566_vm1, %v1553_v48, %v2960_v55  ;;  %v1620_v30 = vsel %vm1599_vm2, %v1587_v15, %v3098_v32  ;;  %v2250_v58 = vld [vmem:[%s2384_s20 + $0xc2] sm:$0xff]  ;;  %v4276_v15 = vld [vmem:[#allocation57_spill] sm:$0xff] }
 0x207   : > { %v1619_v56 = vsel %vm1599_vm2, %v1586_v52, %v3040_v19  ;;  %v1653_v60 = vsel %vm1632_vm3, %v1620_v30, %v3178_v2  ;;  %v1535_v19 = vsel %vm1533_vm0, %v220_v57, %v4273_v25  ;;  %v4274_v2 = vld [vmem:[#allocation17_spill] sm:$0xff] }
 0x208   : > { %v1652_v45 = vsel %vm1632_vm3, %v1619_v56, %v3235_v21  ;;  %v1557_v48 = vsel %vm1533_vm0, %v4275_v10, %v4274_v2  ;;  %v1568_v52 = vsel %vm1566_vm1, %v1535_v19, %v4276_v15  ;;  %v4280_v19 = vld [vmem:[#allocation76_spill] sm:$0xff]  ;;  %v4281_v2 = vld [vmem:[#allocation63_spill] sm:$0xff] }
 0x209   : > { %v1601_v21 = vsel %vm1599_vm2, %v1568_v52, %v2968_v35  ;;  %v1590_v30 = vsel %vm1566_vm1, %v1557_v48, %v2970_v62 }
 0x20a   : > { %1365 = vrot.lane.b32.xlu2 %v3086_v23, %s2343_s27  ;;  %1333 = vrot.lane.b32.xlu1 %v2218_v24, %s2343_s27  ;;  %v1634_v56 = vsel %vm1632_vm3, %v1601_v21, %v3144_v47  ;;  %v4282_v21 = vld [vmem:[#allocation87_spill] sm:$0xff] }
 0x20b   : > { %1237 = vrot.lane.b32.xlu0 %v4272_v38, %s2342_s26  ;;  %v1623_v38 = vsel %vm1599_vm2, %v1590_v30, %v3110_v13  ;;  %v1667_v62 = vsel %vm1665_vm4, %v1634_v56, %v3376_v17  ;;  %v4279_v17 = vld [vmem:[#allocation21_spill] sm:$0xff] }
 0x20c   : > { %v3490_v54 = vpop.permute.xlu2 %1113  ;;  %v1094_v23 = vpop.permute.xlu1 %1093  ;;  %v1656_v35 = vsel %vm1632_vm3, %v1623_v38, %v3190_v44  ;;  %v4278_v44 = vld [vmem:[#allocation38_spill] sm:$0xff] }
 0x20d   : > { %v3496_v55 = vsel %vm1665_vm4, %v1653_v60, %v1094_v23  ;;  %v1092_v32 = vpop.permute.xlu0 %1091 }
 0x20e   : > { %v3499_v24 = vsel %vm1665_vm4, %v1652_v45, %v1092_v32  ;;  %v2233_v45 = vld [vmem:[%s2384_s20 + $0x171] sm:$0xff] }
 0x20f   : > { %v2217_v32 = vld [vmem:[%s2384_s20 + $0xb1] sm:$0xff] }
 0x212   : > { %1203 = vrot.lane.b32.xlu2 %v2185_v6, %s2342_s26  ;;  %1493 = vrot.lane.b32.xlu1 %v3225_v27, %s2344_s28  ;;  %v4277_v6 = vld [vmem:[#allocation2_spill] sm:$0xff] }
 0x213   : > { %1461 = vrot.lane.b32.xlu0 %v2250_v58, %s2344_s28  ;;  %v1538_v25 = vsel %vm1533_vm0, %v4278_v44, %v4277_v6  ;;  %v1560_v58 = vsel %vm1533_vm0, %v4280_v19, %v4279_v17  ;;  %v4286_v6 = vld [vmem:[#allocation69_spill] sm:$0xff] }
 0x214   : > { %v1184_v60 = vpop.permute.xlu2 %1183  ;;  %v1100_v23 = vpop.permute.xlu1 %1099  ;;  %v1571_v10 = vsel %vm1566_vm1, %v1538_v25, %v4281_v2  ;;  %v219_v2 = vld [vmem:[%s2384_s20] sm:$0xff] }
 0x215   : > { %v3527_v57 = vsel %vm1698_vm5, %v1667_v62, %v1184_v60  ;;  %v3530_v27 = vsel %vm1665_vm4, %v1656_v35, %v1100_v23  ;;  %v1098_v13 = vpop.permute.xlu0 %1097  ;;  %v1604_v48 = vsel %vm1599_vm2, %v1571_v10, %v2980_v0  ;;  %v2184_v62 = vld [vmem:[%s2384_s20 + $0xa8] sm:$0xff]  ;;  %v2265_v60 = vld [vmem:[%s2384_s20 + $0x172] sm:$0xff] }
 0x216   : > { %v3534_v47 = vsel %vm1665_vm4, %v3265_v16, %v1098_v13  ;;  %v1593_v16 = vsel %vm1566_vm1, %v1560_v58, %v2982_v4  ;;  %v1637_v52 = vsel %vm1632_vm3, %v1604_v48, %v3156_v53  ;;  %v4283_v23 = vld [vmem:[#allocation12_spill] sm:$0xff]  ;;  %v4284_v13 = vld [vmem:[#allocation27_spill] sm:$0xff] }
 0x217   : > { %v1626_v15 = vsel %vm1599_vm2, %v1593_v16, %v3122_v33  ;;  %v1670_v4 = vsel %vm1665_vm4, %v1637_v52, %v3390_v28  ;;  %v2249_v28 = vld [vmem:[%s2384_s20 + $0xb2] sm:$0xff]  ;;  %v2232_v16 = vld [vmem:[%s2384_s20 + $0x169] sm:$0xff] }
 0x218   : > { %v1659_v0 = vsel %vm1632_vm3, %v1626_v15, %v3214_v36  ;;  %v1541_v36 = vsel %vm1533_vm0, %v4240_v31, %v4283_v23  ;;  %v4287_v15 = vld [vmem:[#allocation7_spill] sm:$0xff] }
 0x219   : > { %v1574_v44 = vsel %vm1566_vm1, %v1541_v36, %v4286_v6  ;;  %v2200_v52 = vld [vmem:[%s2384_s20 + $0x168] sm:$0xff]  ;;  %v2199_v36 = vld [vmem:[%s2384_s20 + $0x158] sm:$0xff] }
 0x21a   : > { %1363 = vrot.lane.b32.xlu2 %v2233_v45, %s2343_s27  ;;  %1331 = vrot.lane.b32.xlu1 %v2217_v32, %s2343_s27  ;;  %v4285_v45 = vld [vmem:[#allocation82_spill] sm:$0xff]  ;;  %v1607_v25 = vsel %vm1599_vm2, %v1574_v44, %v2992_v7 }
 0x21b   : > { %1235 = vrot.lane.b32.xlu0 %v4282_v21, %s2342_s26  ;;  %v1563_v32 = vsel %vm1533_vm0, %v4285_v45, %v4284_v13  ;;  %v1640_v17 = vsel %vm1632_vm3, %v1607_v25, %v3168_v59  ;;  %v2248_v13 = vld [vmem:[%s2384_s20 + $0xaa] sm:$0xff]  ;;  %v2247_v25 = vld [vmem:[%s2384_s20 + $0x9a] sm:$0xff] }
 0x21c   : > { %v1190_v30 = vpop.permute.xlu2 %1189  ;;  %v1106_v38 = vpop.permute.xlu1 %1105 }
 0x21d   : > { %v3563_v56 = vsel %vm1698_vm5, %v1670_v4, %v1190_v30  ;;  %v3566_v35 = vsel %vm1665_vm4, %v1659_v0, %v1106_v38  ;;  %v1104_v33 = vpop.permute.xlu0 %1103  ;;  %v4288_v0 = vld [vmem:[#allocation33_spill] sm:$0xff]  ;;  %v4289_v38 = vld [vmem:[#allocation22_spill] sm:$0xff] }
 0x21e   : > { %v3570_v53 = vsel %vm1665_vm4, %v3303_v40, %v1104_v33  ;;  %v1596_v40 = vsel %vm1566_vm1, %v1563_v32, %v2994_v8  ;;  %v1673_v8 = vsel %vm1665_vm4, %v1640_v17, %v3412_v43  ;;  %v1534_v43 = vsel %vm1533_vm0, %v219_v2, %v4287_v15  ;;  %v4293_v2 = vld [vmem:[#allocation45_spill] sm:$0xff] }
 0x21f   : > { %v1629_v31 = vsel %vm1599_vm2, %v1596_v40, %v3134_v37  ;;  %v1567_v4 = vsel %vm1566_vm1, %v1534_v43, %v4288_v0  ;;  %v2231_v40 = vld [vmem:[%s2384_s20 + $0x159] sm:$0xff]  ;;  %v4297_v43 = vld [vmem:[#allocation103_spill] sm:$0xff] }
 0x220   : > { %v1662_v7 = vsel %vm1632_vm3, %v1629_v31, %v3233_v46  ;;  %v2216_v46 = vld [vmem:[%s2384_s20 + $0xa9] sm:$0xff]  ;;  %v1600_v30 = vsel %vm1599_vm2, %v1567_v4, %v3006_v11  ;;  %v4290_v31 = vld [vmem:[#allocation13_spill] sm:$0xff] }
 0x221   : > { %v1540_v17 = vsel %vm1533_vm0, %v4243_v26, %v4290_v31  ;;  %v4296_v26 = vld [vmem:[#allocation92_spill] sm:$0xff]  ;;  %v4298_v0 = vld [vmem:[#allocation99_spill] sm:$0xff]  ;;  %v4301_v31 = vld [vmem:[#allocation42_spill] sm:$0xff] }
 0x222   : > { %1201 = vrot.lane.b32.xlu2 %v2184_v62, %s2342_s26  ;;  %1491 = vrot.lane.b32.xlu1 %v2265_v60, %s2344_s28 }
 0x223   : > { %1459 = vrot.lane.b32.xlu0 %v2249_v28, %s2344_s28  ;;  %v2264_v28 = vld [vmem:[%s2384_s20 + $0x16a] sm:$0xff] }
 0x224   : > { %v1196_v19 = vpop.permute.xlu2 %1195  ;;  %v1112_v58 = vpop.permute.xlu1 %1111 }
 0x225   : > { %v3600_v10 = vsel %vm1698_vm5, %v1673_v8, %v1196_v19  ;;  %v3603_v48 = vsel %vm1665_vm4, %v1662_v7, %v1112_v58  ;;  %v1110_v37 = vpop.permute.xlu0 %1109  ;;  %v2215_v7 = vld [vmem:[%s2384_s20 + $0x99] sm:$0xff]  ;;  %v4291_v8 = vld [vmem:[#allocation3_spill] sm:$0xff]  ;;  %v4292_v19 = vld [vmem:[#allocation36_spill] sm:$0xff] }
 0x226   : > { %v3607_v59 = vsel %vm1665_vm4, %v3331_v3, %v1110_v37  ;;  %v1633_v3 = vsel %vm1632_vm3, %v1600_v30, %v3146_v41  ;;  %v1539_v58 = vsel %vm1533_vm0, %v4292_v19, %v4291_v8  ;;  %v4294_v37 = vld [vmem:[#allocation62_spill] sm:$0xff]  ;;  %v4303_v8 = vld [vmem:[#allocation68_spill] sm:$0xff] }
 0x227   : > { %v1666_v33 = vsel %vm1665_vm4, %v1633_v3, %v4289_v38 }
 0x22a   : > { %1361 = vrot.lane.b32.xlu2 %v2232_v16, %s2343_s27  ;;  %1329 = vrot.lane.b32.xlu1 %v2216_v46, %s2343_s27  ;;  %v1572_v16 = vsel %vm1566_vm1, %v1539_v58, %v4294_v37  ;;  %v4304_v58 = vld [vmem:[#allocation93_spill] sm:$0xff] }
 0x22b   : > { %1233 = vrot.lane.b32.xlu0 %v2200_v52, %s2342_s26  ;;  %v1605_v15 = vsel %vm1599_vm2, %v1572_v16, %v4296_v26  ;;  %v4306_v37 = vld [vmem:[#allocation105_spill] sm:$0xff] }
 0x22c   : > { %v3625_v62 = vpop.permute.xlu2 %1211  ;;  %v1182_v60 = vpop.permute.xlu1 %1181  ;;  %v1638_v4 = vsel %vm1632_vm3, %v1605_v15, %v4298_v0 }
 0x22d   : > { %v3628_v23 = vsel %vm1698_vm5, %v1666_v33, %v1182_v60  ;;  %v3630_v11 = vpop.permute.xlu0 %1115  ;;  %v1671_v33 = vsel %vm1665_vm4, %v1638_v4, %v3384_v22 }
 0x232   : > { %1231 = vrot.lane.b32.xlu2 %v2199_v36, %s2342_s26  ;;  %1489 = vrot.lane.b32.xlu1 %v2264_v28, %s2344_s28 }
 0x233   : > { %1457 = vrot.lane.b32.xlu0 %v2248_v13, %s2344_s28  ;;  %v2214_v13 = vld [vmem:[%s2384_s20 + $0x91] sm:$0xff] }
 0x234   : > { %v3638_v41 = vpop.permute.xlu2 %1371  ;;  %v1188_v45 = vpop.permute.xlu1 %1187 }
 0x235   : > { %v3642_v32 = vsel %vm1698_vm5, %v3300_v14, %v1188_v45  ;;  %v1186_v6 = vpop.permute.xlu0 %1185  ;;  %v1573_v14 = vsel %vm1566_vm1, %v1540_v17, %v4293_v2  ;;  %v2198_v45 = vld [vmem:[%s2384_s20 + $0x150] sm:$0xff] }
 0x236   : > { %v3646_v44 = vsel %vm1698_vm5, %v3374_v51, %v1186_v6  ;;  %v4295_v51 = vld [vmem:[#allocation91_spill] sm:$0xff]  ;;  %v4299_v6 = vld [vmem:[#allocation16_spill] sm:$0xff] }
 0x237   : > { %v1606_v46 = vsel %vm1599_vm2, %v1573_v14, %v4295_v51  ;;  %v4307_v51 = vld [vmem:[#allocation100_spill] sm:$0xff] }
 0x238   : > { %v1639_v52 = vsel %vm1632_vm3, %v1606_v46, %v4297_v43 }
 0x239   : > { %v1672_v30 = vsel %vm1665_vm4, %v1639_v52, %v3326_v20  ;;  %v2263_v20 = vld [vmem:[%s2384_s20 + $0x15a] sm:$0xff] }
 0x23a   : > { %1455 = vrot.lane.b32.xlu2 %v2247_v25, %s2344_s28  ;;  %1359 = vrot.lane.b32.xlu1 %v2231_v40, %s2343_s27  ;;  %v1543_v25 = vsel %vm1533_vm0, %v4249_v63, %v4299_v6  ;;  %v4300_v40 = vld [vmem:[#allocation4_spill] sm:$0xff]  ;;  %v4305_v63 = vld [vmem:[#allocation94_spill] sm:$0xff]  ;;  %v4309_v6 = vld [vmem:[#allocation89_spill] sm:$0xff] }
 0x23b   : > { %1327 = vrot.lane.b32.xlu0 %v2215_v7, %s2343_s27  ;;  %v1542_v17 = vsel %vm1533_vm0, %v4301_v31, %v4300_v40  ;;  %v4302_v7 = vld [vmem:[#allocation50_spill] sm:$0xff] }
 0x23c   : > { %v3674_v3 = vpop.permute.xlu2 %1209  ;;  %v1194_v38 = vpop.permute.xlu1 %1193  ;;  %v1576_v22 = vsel %vm1566_vm1, %v1543_v25, %v4302_v7  ;;  %v1575_v19 = vsel %vm1566_vm1, %v1542_v17, %v4303_v8  ;;  %v4310_v40 = vld [vmem:[#allocation98_spill] sm:$0xff] }
 0x23d   : > { %v3679_v60 = vsel %vm1698_vm5, %v1672_v30, %v1194_v38  ;;  %v1192_v36 = vpop.permute.xlu0 %1191  ;;  %v1609_v2 = vsel %vm1599_vm2, %v1576_v22, %v4304_v58  ;;  %v1608_v14 = vsel %vm1599_vm2, %v1575_v19, %v4305_v63  ;;  %v2262_v38 = vld [vmem:[%s2384_s20 + $0x152] sm:$0xff]  ;;  %v2229_v7 = vld [vmem:[%s2384_s20 + $0x141] sm:$0xff] }
 0x23e   : > { %v3682_v28 = vsel %vm1698_vm5, %v1671_v33, %v1192_v36  ;;  %v1642_v16 = vsel %vm1632_vm3, %v1609_v2, %v4306_v37  ;;  %v1641_v46 = vsel %vm1632_vm3, %v1608_v14, %v4307_v51  ;;  %v2246_v33 = vld [vmem:[%s2384_s20 + $0x92] sm:$0xff]  ;;  %v2213_v22 = vld [vmem:[%s2384_s20 + $0x81] sm:$0xff] }
 0x23f   : > { %v1675_v26 = vsel %vm1665_vm4, %v1642_v16, %v3347_v18  ;;  %v1674_v52 = vsel %vm1665_vm4, %v1641_v46, %v3407_v39  ;;  %v2230_v36 = vld [vmem:[%s2384_s20 + $0x151] sm:$0xff]  ;;  %v4308_v18 = vld [vmem:[#allocation51_spill] sm:$0xff]  ;;  %v2197_v19 = vld [vmem:[%s2384_s20 + $0x140] sm:$0xff] }
 0x240   : > { %v1565_v39 = vsel %vm1533_vm0, %v4282_v21, %v4308_v18  ;;  %v2245_v51 = vld [vmem:[%s2384_s20 + $0x82] sm:$0xff] }
 0x241   : > { %v1598_v25 = vsel %vm1566_vm1, %v1565_v39, %v4309_v6  ;;  %v1696_v39 = vsel %vm1665_vm4, %v3354_v42, %v3490_v54  ;;  %v4313_v6 = vld [vmem:[#allocation97_spill] sm:$0xff] }
 0x242   : > { %1325 = vrot.lane.b32.xlu2 %v2214_v13, %s2343_s27  ;;  %1229 = vrot.lane.b32.xlu1 %v2198_v45, %s2342_s26  ;;  %v1631_v31 = vsel %vm1599_vm2, %v1598_v25, %v4310_v40  ;;  %v4314_v40 = vld [vmem:[#allocation102_spill] sm:$0xff] }
 0x243   : > { %1487 = vrot.lane.b32.xlu0 %v2263_v20, %s2344_s28  ;;  %v1664_v17 = vsel %vm1632_vm3, %v1631_v31, %v3349_v12  ;;  %v1714_v12 = vsel %vm1698_vm5, %v3388_v1, %v3625_v62  ;;  %v2196_v1 = vld [vmem:[%s2384_s20 + $0x138] sm:$0xff]  ;;  %v2261_v62 = vld [vmem:[%s2384_s20 + $0x142] sm:$0xff] }
 0x244   : > { %v3710_v15 = vpop.permute.xlu2 %1369  ;;  %v1200_v43 = vpop.permute.xlu1 %1199  ;;  %v1697_v8 = vsel %vm1665_vm4, %v1664_v17, %v3630_v11 }
 0x245   : > { %v3715_v0 = vsel %vm1698_vm5, %v1675_v26, %v1200_v43  ;;  %v1198_v4 = vpop.permute.xlu0 %1197  ;;  %v2324_v43 = vld [vmem:[%s2384_s20 + $0xa8] sm:$0xff] }
 0x246   : > { %v3718_v30 = vsel %vm1698_vm5, %v1674_v52, %v1198_v4  ;;  %v4311_v52 = vld [vmem:[#allocation8_spill] sm:$0xff] }
 0x247   : > { %v1548_v4 = vsel %vm1533_vm0, %v2324_v43, %v4311_v52  ;;  %v4317_v43 = vld [vmem:[#allocation90_spill] sm:$0xff] }
 0x24a   : > { %1485 = vrot.lane.b32.xlu2 %v2262_v38, %s2344_s28  ;;  %1453 = vrot.lane.b32.xlu1 %v2246_v33, %s2344_s28  ;;  %v2244_v38 = vld [vmem:[%s2384_s20 + $0x7a] sm:$0xff] }
 0x24b   : > { %1357 = vrot.lane.b32.xlu0 %v2230_v36, %s2343_s27  ;;  %v2228_v33 = vld [vmem:[%s2384_s20 + $0x139] sm:$0xff]  ;;  %v4312_v36 = vld [vmem:[#allocation80_spill] sm:$0xff] }
 0x24c   : > { %v3729_v13 = vpop.permute.xlu2 %1207  ;;  %v1340_v45 = vpop.permute.xlu1 %1339  ;;  %v1581_v18 = vsel %vm1566_vm1, %v1548_v4, %v4312_v36 }
 0x24d   : > { %v1244_v20 = vpop.permute.xlu0 %1243  ;;  %v1747_v63 = vsel %vm1731_vm6, %v1714_v12, %v1340_v45  ;;  %v2212_v45 = vld [vmem:[%s2384_s20 + $0x79] sm:$0xff]  ;;  %v1614_v25 = vsel %vm1599_vm2, %v1581_v18, %v4313_v6  ;;  %v2195_v12 = vld [vmem:[%s2384_s20 + $0x128] sm:$0xff] }
 0x24e   : > { %v1730_v21 = vsel %vm1698_vm5, %v1697_v8, %v1244_v20  ;;  %v1647_v31 = vsel %vm1632_vm3, %v1614_v25, %v4314_v40  ;;  %v2210_v40 = vld [vmem:[%s2384_s20 + $0x61] sm:$0xff] }
 0x24f   : > { %v1763_v2 = vsel %vm1731_vm6, %v1730_v21, %v3638_v41  ;;  %v1680_v17 = vsel %vm1665_vm4, %v1647_v31, %v3434_v34  ;;  %v2194_v31 = vld [vmem:[%s2384_s20 + $0x120] sm:$0xff] }
 0x250   : > { %v1713_v42 = vsel %vm1698_vm5, %v1680_v17, %v3674_v3  ;;  %v2211_v3 = vld [vmem:[%s2384_s20 + $0x69] sm:$0xff] }
 0x252   : > { %1355 = vrot.lane.b32.xlu2 %v2229_v7, %s2343_s27  ;;  %1323 = vrot.lane.b32.xlu1 %v2213_v22, %s2343_s27 }
 0x253   : > { %1227 = vrot.lane.b32.xlu0 %v2197_v19, %s2342_s26 }
 0x254   : > { %v3749_v11 = vpop.permute.xlu2 %1367  ;;  %v1500_v58 = vpop.permute.xlu1 %1499 }
 0x255   : > { %v1468_v14 = vpop.permute.xlu0 %1467  ;;  %v1796_v37 = vsel %vm1764_vm7, %v1763_v2, %v1500_v58  ;;  %v2260_v58 = vld [vmem:[%s2384_s20 + $0x13a] sm:$0xff] }
 0x256   : > { %v1780_v16 = vsel %vm1764_vm7, %v1747_v63, %v1468_v14  ;;  %2287 = vmatpush.xpose.msk.msra.mxu1 %vm1798_vm8, %v1796_v37  ;;  %v2325_v14 = vld [vmem:[%s2384_s20 + $0x98] sm:$0xff]  ;;  %v4315_v37 = vld [vmem:[#allocation18_spill] sm:$0xff] }
 0x257   : > { %2270 = vmatpush.xpose.msk.msra.mxu0 %vm1798_vm8, %v1780_v16  ;;  %v1547_v16 = vsel %vm1533_vm0, %v2325_v14, %v4315_v37  ;;  %v4322_v14 = vld [vmem:[#allocation107_spill] sm:$0xff] }
 0x25a   : > { %1225 = vrot.lane.b32.xlu2 %v2196_v1, %s2342_s26  ;;  %1483 = vrot.lane.b32.xlu1 %v2261_v62, %s2344_s28  ;;  %v2259_v1 = vld [vmem:[%s2384_s20 + $0x12a] sm:$0xff] }
 0x25b   : > { %1451 = vrot.lane.b32.xlu0 %v2245_v51, %s2344_s28  ;;  %v2243_v62 = vld [vmem:[%s2384_s20 + $0x6a] sm:$0xff]  ;;  %v4316_v51 = vld [vmem:[#allocation81_spill] sm:$0xff] }
 0x25c   : > { %v3764_v41 = vpop.permute.xlu2 %1205  ;;  %v1338_v46 = vpop.permute.xlu1 %1337 }
 0x25d   : > { %v1242_v26 = vpop.permute.xlu0 %1241  ;;  %v1746_v8 = vsel %vm1731_vm6, %v1713_v42, %v1338_v46  ;;  %v1580_v46 = vsel %vm1566_vm1, %v1547_v16, %v4316_v51  ;;  %v4323_v16 = vld [vmem:[#allocation60_spill] sm:$0xff] }
 0x25e   : > { %v1729_v20 = vsel %vm1698_vm5, %v1696_v39, %v1242_v26  ;;  %v2227_v26 = vld [vmem:[%s2384_s20 + $0x129] sm:$0xff]  ;;  %v1613_v52 = vsel %vm1599_vm2, %v1580_v46, %v4317_v43 }
 0x25f   : > { %v1762_v22 = vsel %vm1731_vm6, %v1729_v20, %v3710_v15 }
 0x262   : > { %1449 = vrot.lane.b32.xlu2 %v2244_v38, %s2344_s28  ;;  %1353 = vrot.lane.b32.xlu1 %v2228_v33, %s2343_s27  ;;  %v4318_v38 = vld [vmem:[#allocation106_spill] sm:$0xff] }
 0x263   : > { %1321 = vrot.lane.b32.xlu0 %v2212_v45, %s2343_s27  ;;  %v1646_v33 = vsel %vm1632_vm3, %v1613_v52, %v4318_v38  ;;  %v2225_v38 = vld [vmem:[%s2384_s20 + $0x111] sm:$0xff] }
 0x264   : > { %v3789_v54 = vpop.permute.xlu2 %1365  ;;  %v1498_v7 = vpop.permute.xlu1 %1497  ;;  %v1679_v36 = vsel %vm1665_vm4, %v1646_v33, %v3440_v50  ;;  %v2209_v33 = vld [vmem:[%s2384_s20 + $0x51] sm:$0xff] }
 0x265   : > { %v1466_v19 = vpop.permute.xlu0 %1465  ;;  %v1795_v21 = vsel %vm1764_vm7, %v1762_v22, %v1498_v7  ;;  %v1712_v18 = vsel %vm1698_vm5, %v1679_v36, %v3729_v13  ;;  %v2226_v13 = vld [vmem:[%s2384_s20 + $0x121] sm:$0xff]  ;;  %v2326_v7 = vld [vmem:[%s2384_s20 + $0x90] sm:$0xff] }
 0x266   : > { %v1779_v34 = vsel %vm1764_vm7, %v1746_v8, %v1466_v19  ;;  %2288 = vmatpush.xpose.msk.msra.mxu1 %vm1798_vm8, %v1795_v21  ;;  %v4319_v22 = vld [vmem:[#allocation19_spill] sm:$0xff]  ;;  %v2193_v19 = vld [vmem:[%s2384_s20 + $0x110] sm:$0xff] }
 0x267   : > { %2271 = vmatpush.xpose.msk.msra.mxu0 %vm1798_vm8, %v1779_v34  ;;  %v1546_v8 = vsel %vm1533_vm0, %v2326_v7, %v4319_v22  ;;  %v2258_v21 = vld [vmem:[%s2384_s20 + $0x122] sm:$0xff]  ;;  %v4327_v7 = vld [vmem:[#allocation101_spill] sm:$0xff] }
 0x268   : > { %v4320_v34 = vld [vmem:[#allocation55_spill] sm:$0xff] }
 0x26a   : > { %1319 = vrot.lane.b32.xlu2 %v2211_v3, %s2343_s27  ;;  %1223 = vrot.lane.b32.xlu1 %v2195_v12, %s2342_s26  ;;  %v1579_v3 = vsel %vm1566_vm1, %v1546_v8, %v4320_v34  ;;  %v2242_v12 = vld [vmem:[%s2384_s20 + $0x62] sm:$0xff] }
 0x26b   : > { %1481 = vrot.lane.b32.xlu0 %v2260_v58, %s2344_s28  ;;  %v4321_v58 = vld [vmem:[#allocation95_spill] sm:$0xff] }
 0x26c   : > { %v3804_v15 = vpop.permute.xlu2 %1203  ;;  %v1336_v2 = vpop.permute.xlu1 %1335 }
 0x26d   : > { %v1240_v63 = vpop.permute.xlu0 %1239  ;;  %v1745_v6 = vsel %vm1731_vm6, %v1712_v18, %v1336_v2  ;;  %v1612_v2 = vsel %vm1599_vm2, %v1579_v3, %v4321_v58 }
 0x26e   : > { %v1728_v4 = vsel %vm1698_vm5, %v3603_v48, %v1240_v63  ;;  %v1645_v37 = vsel %vm1632_vm3, %v1612_v2, %v4322_v14  ;;  %v2240_v2 = vld [vmem:[%s2384_s20 + $0x4a] sm:$0xff] }
 0x26f   : > { %v1761_v45 = vsel %vm1731_vm6, %v1728_v4, %v3749_v11 }
 0x272   : > { %1479 = vrot.lane.b32.xlu2 %v2259_v1, %s2344_s28  ;;  %1447 = vrot.lane.b32.xlu1 %v2243_v62, %s2344_s28  ;;  %v1678_v1 = vsel %vm1665_vm4, %v1645_v37, %v4323_v16  ;;  %v2328_v16 = vld [vmem:[%s2384_s20 + $0x78] sm:$0xff] }
 0x273   : > { %1351 = vrot.lane.b32.xlu0 %v2227_v26, %s2343_s27  ;;  %v1711_v62 = vsel %vm1698_vm5, %v1678_v1, %v3764_v41  ;;  %v2241_v41 = vld [vmem:[%s2384_s20 + $0x52] sm:$0xff]  ;;  %v4328_v1 = vld [vmem:[#allocation15_spill] sm:$0xff] }
 0x274   : > { %v3827_v39 = vpop.permute.xlu2 %1363  ;;  %v1496_v48 = vpop.permute.xlu1 %1495 }
 0x275   : > { %v1464_v25 = vpop.permute.xlu0 %1463  ;;  %v1794_v20 = vsel %vm1764_vm7, %v1761_v45, %v1496_v48  ;;  %v2327_v48 = vld [vmem:[%s2384_s20 + $0x80] sm:$0xff]  ;;  %v4324_v45 = vld [vmem:[#allocation5_spill] sm:$0xff] }
 0x276   : > { %v1778_v50 = vsel %vm1764_vm7, %v1745_v6, %v1464_v25  ;;  %2289 = vmatpush.xpose.msk.msra.mxu1 %vm1798_vm8, %v1794_v20  ;;  %v1545_v6 = vsel %vm1533_vm0, %v2327_v48, %v4324_v45  ;;  %v2208_v25 = vld [vmem:[%s2384_s20 + $0x49] sm:$0xff] }
 0x277   : > { %2272 = vmatpush.xpose.msk.msra.mxu0 %vm1798_vm8, %v1778_v50  ;;  %v2192_v20 = vld [vmem:[%s2384_s20 + $0x108] sm:$0xff]  ;;  %v4325_v50 = vld [vmem:[#allocation74_spill] sm:$0xff] }
 0x27a   : > { %1349 = vrot.lane.b32.xlu2 %v2226_v13, %s2343_s27  ;;  %1317 = vrot.lane.b32.xlu1 %v2210_v40, %s2343_s27  ;;  %v1578_v13 = vsel %vm1566_vm1, %v1545_v6, %v4325_v50  ;;  %v2257_v40 = vld [vmem:[%s2384_s20 + $0x112] sm:$0xff] }
 0x27b   : > { %1221 = vrot.lane.b32.xlu0 %v2194_v31, %s2342_s26  ;;  %v4326_v31 = vld [vmem:[#allocation96_spill] sm:$0xff] }
 0x27c   : > { %v3842_v11 = vpop.permute.xlu2 %1201  ;;  %v1334_v17 = vpop.permute.xlu1 %1333 }
 0x27d   : > { %v1238_v42 = vpop.permute.xlu0 %1237  ;;  %v1744_v26 = vsel %vm1731_vm6, %v1711_v62, %v1334_v17  ;;  %v1611_v17 = vsel %vm1599_vm2, %v1578_v13, %v4326_v31  ;;  %v1544_v62 = vsel %vm1533_vm0, %v2328_v16, %v4328_v1 }
 0x27e   : > { %v1727_v63 = vsel %vm1698_vm5, %v3607_v59, %v1238_v42  ;;  %v1644_v22 = vsel %vm1632_vm3, %v1611_v17, %v4327_v7 }
 0x27f   : > { %v1760_v46 = vsel %vm1731_vm6, %v1727_v63, %v3789_v54  ;;  %v1677_v8 = vsel %vm1665_vm4, %v1644_v22, %v3420_v5  ;;  %v2224_v63 = vld [vmem:[%s2384_s20 + $0x109] sm:$0xff]  ;;  %v2222_v22 = vld [vmem:[%s2384_s20 + $0xf1] sm:$0xff] }
 0x282   : > { %1219 = vrot.lane.b32.xlu2 %v2193_v19, %s2342_s26  ;;  %1477 = vrot.lane.b32.xlu1 %v2258_v21, %s2344_s28  ;;  %v1710_v19 = vsel %vm1698_vm5, %v1677_v8, %v3804_v15  ;;  %v2256_v15 = vld [vmem:[%s2384_s20 + $0x10a] sm:$0xff]  ;;  %v2238_v8 = vld [vmem:[%s2384_s20 + $0x32] sm:$0xff] }
 0x283   : > { %1445 = vrot.lane.b32.xlu0 %v2242_v12, %s2344_s28 }
 0x284   : > { %v3865_v51 = vpop.permute.xlu2 %1361  ;;  %v1494_v59 = vpop.permute.xlu1 %1493 }
 0x285   : > { %v1462_v43 = vpop.permute.xlu0 %1461  ;;  %v1793_v52 = vsel %vm1764_vm7, %v1760_v46, %v1494_v59  ;;  %v2223_v59 = vld [vmem:[%s2384_s20 + $0xf9] sm:$0xff] }
 0x286   : > { %v1777_v4 = vsel %vm1764_vm7, %v1744_v26, %v1462_v43  ;;  %2290 = vmatpush.xpose.msk.msra.mxu1 %vm1798_vm8, %v1793_v52  ;;  %v2207_v46 = vld [vmem:[%s2384_s20 + $0x39] sm:$0xff]  ;;  %v4329_v26 = vld [vmem:[#allocation75_spill] sm:$0xff] }
 0x287   : > { %2273 = vmatpush.xpose.msk.msra.mxu0 %vm1798_vm8, %v1777_v4  ;;  %v1577_v43 = vsel %vm1566_vm1, %v1544_v62, %v4329_v26  ;;  %v2191_v52 = vld [vmem:[%s2384_s20 + $0xf8] sm:$0xff]  ;;  %v4330_v4 = vld [vmem:[#allocation88_spill] sm:$0xff] }
 0x28a   : > { %1443 = vrot.lane.b32.xlu2 %v2241_v41, %s2344_s28  ;;  %1347 = vrot.lane.b32.xlu1 %v2225_v38, %s2343_s27  ;;  %v1610_v41 = vsel %vm1599_vm2, %v1577_v43, %v4330_v4 }
 0x28b   : > { %1315 = vrot.lane.b32.xlu0 %v2209_v33, %s2343_s27  ;;  %v4331_v33 = vld [vmem:[#allocation104_spill] sm:$0xff] }
 0x28c   : > { %v3880_v54 = vpop.permute.xlu2 %1231  ;;  %v1332_v36 = vpop.permute.xlu1 %1331 }
 0x28d   : > { %v1236_v18 = vpop.permute.xlu0 %1235  ;;  %v1743_v3 = vsel %vm1731_vm6, %v1710_v19, %v1332_v36  ;;  %v1643_v36 = vsel %vm1632_vm3, %v1610_v41, %v4331_v33  ;;  %v2206_v19 = vld [vmem:[%s2384_s20 + $0x31] sm:$0xff] }
 0x28e   : > { %v1726_v42 = vsel %vm1698_vm5, %v3459_v9, %v1236_v18  ;;  %v1676_v18 = vsel %vm1665_vm4, %v1643_v36, %v3426_v61  ;;  %v2190_v61 = vld [vmem:[%s2384_s20 + $0xf0] sm:$0xff] }
 0x28f   : > { %v1759_v34 = vsel %vm1731_vm6, %v1726_v42, %v3827_v39  ;;  %v1709_v48 = vsel %vm1698_vm5, %v1676_v18, %v3842_v11  ;;  %v2255_v11 = vld [vmem:[%s2384_s20 + $0xfa] sm:$0xff] }
 0x292   : > { %1313 = vrot.lane.b32.xlu2 %v2208_v25, %s2343_s27  ;;  %1217 = vrot.lane.b32.xlu1 %v2192_v20, %s2342_s26 }
 0x293   : > { %1475 = vrot.lane.b32.xlu0 %v2257_v40, %s2344_s28  ;;  %v2239_v40 = vld [vmem:[%s2384_s20 + $0x3a] sm:$0xff] }
 0x294   : > { %v1456_v21 = vpop.permute.xlu2 %1455  ;;  %v1492_v9 = vpop.permute.xlu1 %1491 }
 0x295   : > { %v1460_v12 = vpop.permute.xlu0 %1459  ;;  %v1792_v58 = vsel %vm1764_vm7, %v1759_v34, %v1492_v9  ;;  %v1724_v9 = vsel %vm1698_vm5, %v3570_v53, %v3880_v54 }
 0x296   : > { %v1776_v5 = vsel %vm1764_vm7, %v1743_v3, %v1460_v12  ;;  %2291 = vmatpush.xpose.msk.msra.mxu1 %vm1798_vm8, %v1792_v58  ;;  %v2254_v58 = vld [vmem:[%s2384_s20 + $0xf2] sm:$0xff] }
 0x297   : > { %2274 = vmatpush.xpose.msk.msra.mxu0 %vm1798_vm8, %v1776_v5 }
 0x29a   : > { %1473 = vrot.lane.b32.xlu2 %v2256_v15, %s2344_s28  ;;  %1441 = vrot.lane.b32.xlu1 %v2240_v2, %s2344_s28  ;;  %v4332_v2 = vld [vmem:[#allocation23_spill] sm:$0xff] }
 0x29b   : > { %1345 = vrot.lane.b32.xlu0 %v2224_v63, %s2343_s27 }
 0x29c   : > { %v1326_v39 = vpop.permute.xlu2 %1325  ;;  %v1330_v14 = vpop.permute.xlu1 %1329 }
 0x29d   : > { %v1234_v37 = vpop.permute.xlu0 %1233  ;;  %v1742_v25 = vsel %vm1731_vm6, %v1709_v48, %v1330_v14  ;;  %v1740_v5 = vsel %vm1731_vm6, %v3718_v30, %v1326_v39 }
 0x29e   : > { %v1725_v38 = vsel %vm1698_vm5, %v3566_v35, %v1234_v37 }
 0x29f   : > { %v1758_v6 = vsel %vm1731_vm6, %v1725_v38, %v3865_v51 }
 0x2a2   : > { %1343 = vrot.lane.b32.xlu2 %v2223_v59, %s2343_s27  ;;  %1311 = vrot.lane.b32.xlu1 %v2207_v46, %s2343_s27 }
 0x2a3   : > { %1215 = vrot.lane.b32.xlu0 %v2191_v52, %s2342_s26 }
 0x2a4   : > { %v1486_v45 = vpop.permute.xlu2 %1485  ;;  %v1490_v35 = vpop.permute.xlu1 %1489 }
 0x2a5   : > { %v1458_v20 = vpop.permute.xlu0 %1457  ;;  %v1791_v50 = vsel %vm1764_vm7, %v1758_v6, %v1490_v35 }
 0x2a6   : > { %v1775_v13 = vsel %vm1764_vm7, %v1742_v25, %v1458_v20  ;;  %2292 = vmatpush.xpose.msk.msra.mxu1 %vm1798_vm8, %v1791_v50  ;;  %v4333_v20 = vld [vmem:[#allocation26_spill] sm:$0xff] }
 0x2a7   : > { %2275 = vmatpush.xpose.msk.msra.mxu0 %vm1798_vm8, %v1775_v13 }
 0x2aa   : > { %1213 = vrot.lane.b32.xlu2 %v2190_v61, %s2342_s26  ;;  %1471 = vrot.lane.b32.xlu1 %v2255_v11, %s2344_s28 }
 0x2ab   : > { %1439 = vrot.lane.b32.xlu0 %v2239_v40, %s2344_s28 }
 0x2ac   : > { %v1360_v51 = vpop.permute.xlu1 %1359  ;;  %v1356_v17 = vpop.permute.xlu2 %1355 }
 0x2ad   : > { %v1328_v31 = vpop.permute.xlu0 %1327 }
 0x2ae   : > { %v1741_v42 = vsel %vm1731_vm6, %v3715_v0, %v1328_v31  ;;  %v1757_v0 = vsel %vm1731_vm6, %v1724_v9, %v1360_v51 }
 0x2af   : > { %v1774_v7 = vsel %vm1764_vm7, %v1741_v42, %v1456_v21 }
 0x2b0   : > { %2276 = vmatpush.xpose.msk.msra.mxu0 %vm1798_vm8, %v1774_v7 }
 0x2b2   : > { %1341 = vrot.lane.b32.xlu1 %v2222_v22, %s2343_s27  ;;  %1437 = vrot.lane.b32.xlu2 %v2238_v8, %s2344_s28 }
 0x2b3   : > { %1309 = vrot.lane.b32.xlu0 %v2206_v19, %s2343_s27 }
 0x2b4   : > { %v1230_v34 = vpop.permute.xlu1 %1229  ;;  %v1226_v12 = vpop.permute.xlu2 %1225 }
 0x2b5   : > { %v1488_v3 = vpop.permute.xlu0 %1487  ;;  %v1723_v63 = vsel %vm1698_vm5, %v4332_v2, %v1230_v34 }
 0x2b6   : > { %v1790_v21 = vsel %vm1764_vm7, %v1757_v0, %v1488_v3 }
 0x2b7   : > { %2293 = vmatpush.xpose.msk.msra.mxu1 %vm1798_vm8, %v1790_v21 }
 0x2bb   : > { %1469 = vrot.lane.b32.xlu0 %v2254_v58, %s2344_s28 }
 0x2bc   : > { %v1454_v15 = vpop.permute.xlu1 %1453  ;;  %v1450_v16 = vpop.permute.xlu2 %1449 }
 0x2bd   : > { %v1358_v53 = vpop.permute.xlu0 %1357  ;;  %v1773_v54 = vsel %vm1764_vm7, %v1740_v5, %v1454_v15 }
 0x2be   : > { %v1756_v14 = vsel %vm1731_vm6, %v1723_v63, %v1358_v53  ;;  %2277 = vmatpush.xpose.msk.msra.mxu0 %vm1798_vm8, %v1773_v54  ;;  %v4334_v53 = vld [vmem:[#allocation25_spill] sm:$0xff] }
 0x2bf   : > { %v1789_v37 = vsel %vm1764_vm7, %v1756_v14, %v1486_v45 }
 0x2c0   : > { %2294 = vmatpush.xpose.msk.msra.mxu1 %vm1798_vm8, %v1789_v37 }
 0x2c4   : > { %v1324_v1 = vpop.permute.xlu1 %1323  ;;  %v1320_v39 = vpop.permute.xlu2 %1319 }
 0x2c5   : > { %v1228_v62 = vpop.permute.xlu0 %1227  ;;  %v1739_v26 = vsel %vm1731_vm6, %v3600_v10, %v1324_v1  ;;  %v1721_v10 = vsel %vm1698_vm5, %v3534_v47, %v1226_v12  ;;  %v1737_v25 = vsel %vm1731_vm6, %v3682_v28, %v1320_v39 }
 0x2c6   : > { %v1722_v30 = vsel %vm1698_vm5, %v3530_v27, %v1228_v62 }
 0x2c7   : > { %v1755_v46 = vsel %vm1731_vm6, %v1722_v30, %v1356_v17 }
 0x2cc   : > { %v1484_v59 = vpop.permute.xlu1 %1483  ;;  %v1480_v33 = vpop.permute.xlu2 %1479 }
 0x2cd   : > { %v1452_v43 = vpop.permute.xlu0 %1451  ;;  %v1788_v52 = vsel %vm1764_vm7, %v1755_v46, %v1484_v59 }
 0x2ce   : > { %v1772_v4 = vsel %vm1764_vm7, %v1739_v26, %v1452_v43  ;;  %2295 = vmatpush.xpose.msk.msra.mxu1 %vm1798_vm8, %v1788_v52 }
 0x2cf   : > { %2278 = vmatpush.xpose.msk.msra.mxu0 %vm1798_vm8, %v1772_v4 }
 0x2d4   : > { %v1354_v41 = vpop.permute.xlu1 %1353  ;;  %v1350_v6 = vpop.permute.xlu2 %1349 }
 0x2d5   : > { %v1322_v38 = vpop.permute.xlu0 %1321  ;;  %v1754_v48 = vsel %vm1731_vm6, %v1721_v10, %v1354_v41 }
 0x2d6   : > { %v1738_v27 = vsel %vm1731_vm6, %v3679_v60, %v1322_v38 }
 0x2d7   : > { %v1771_v36 = vsel %vm1764_vm7, %v1738_v27, %v1450_v16 }
 0x2d8   : > { %2279 = vmatpush.xpose.msk.msra.mxu0 %vm1798_vm8, %v1771_v36 }
 0x2dc   : > { %v1224_v18 = vpop.permute.xlu1 %1223  ;;  %v1220_v40 = vpop.permute.xlu2 %1219 }
 0x2dd   : > { %v1482_v45 = vpop.permute.xlu0 %1481  ;;  %v1720_v50 = vsel %vm1698_vm5, %v4333_v20, %v1224_v18 }
 0x2de   : > { %v1787_v35 = vsel %vm1764_vm7, %v1754_v48, %v1482_v45 }
 0x2df   : > { %2296 = vmatpush.xpose.msk.msra.mxu1 %vm1798_vm8, %v1787_v35 }
 0x2e4   : > { %v1448_v60 = vpop.permute.xlu1 %1447  ;;  %v1444_v17 = vpop.permute.xlu2 %1443 }
 0x2e5   : > { %v1352_v13 = vpop.permute.xlu0 %1351  ;;  %v1770_v61 = vsel %vm1764_vm7, %v1737_v25, %v1448_v60 }
 0x2e6   : > { %v1753_v47 = vsel %vm1731_vm6, %v1720_v50, %v1352_v13  ;;  %2280 = vmatpush.xpose.msk.msra.mxu0 %vm1798_vm8, %v1770_v61 }
 0x2e7   : > { %v1786_v11 = vsel %vm1764_vm7, %v1753_v47, %v1480_v33 }
 0x2e8   : > { %2297 = vmatpush.xpose.msk.msra.mxu1 %vm1798_vm8, %v1786_v11 }
 0x2ec   : > { %v1318_v51 = vpop.permute.xlu1 %1317  ;;  %v1314_v3 = vpop.permute.xlu2 %1313 }
 0x2ed   : > { %v1222_v31 = vpop.permute.xlu0 %1221  ;;  %v1736_v22 = vsel %vm1731_vm6, %v3563_v56, %v1318_v51  ;;  %v1718_v56 = vsel %vm1698_vm5, %v3499_v24, %v1220_v40  ;;  %v1734_v63 = vsel %vm1731_vm6, %v3646_v44, %v1314_v3 }
 0x2ee   : > { %v1719_v28 = vsel %vm1698_vm5, %v3496_v55, %v1222_v31 }
 0x2ef   : > { %v1752_v7 = vsel %vm1731_vm6, %v1719_v28, %v1350_v6 }
 0x2f4   : > { %v1478_v42 = vpop.permute.xlu1 %1477  ;;  %v1474_v2 = vpop.permute.xlu2 %1473 }
 0x2f5   : > { %v1446_v8 = vpop.permute.xlu0 %1445  ;;  %v1785_v19 = vsel %vm1764_vm7, %v1752_v7, %v1478_v42 }
 0x2f6   : > { %v1769_v9 = vsel %vm1764_vm7, %v1736_v22, %v1446_v8  ;;  %2298 = vmatpush.xpose.msk.msra.mxu1 %vm1798_vm8, %v1785_v19 }
 0x2f7   : > { %2281 = vmatpush.xpose.msk.msra.mxu0 %vm1798_vm8, %v1769_v9 }
 0x2fc   : > { %v1348_v34 = vpop.permute.xlu1 %1347  ;;  %v1344_v1 = vpop.permute.xlu2 %1343 }
 0x2fd   : > { %v1316_v0 = vpop.permute.xlu0 %1315  ;;  %v1751_v58 = vsel %vm1731_vm6, %v1718_v56, %v1348_v34 }
 0x2fe   : > { %v1735_v55 = vsel %vm1731_vm6, %v3642_v32, %v1316_v0 }
 0x2ff   : > { %v1768_v21 = vsel %vm1764_vm7, %v1735_v55, %v1444_v17 }
 0x300   : > { %2282 = vmatpush.xpose.msk.msra.mxu0 %vm1798_vm8, %v1768_v21 }
 0x304   : > { %v1218_v12 = vpop.permute.xlu1 %1217  ;;  %v1214_v39 = vpop.permute.xlu2 %1213 }
 0x305   : > { %v1476_v5 = vpop.permute.xlu0 %1475  ;;  %v1717_v54 = vsel %vm1698_vm5, %v4334_v53, %v1218_v12  ;;  %v1715_v36 = vsel %vm1698_vm5, %v3466_v49, %v1214_v39 }
 0x306   : > { %v1784_v15 = vsel %vm1764_vm7, %v1751_v58, %v1476_v5 }
 0x307   : > { %2299 = vmatpush.xpose.msk.msra.mxu1 %vm1798_vm8, %v1784_v15 }
 0x30c   : > { %v1442_v32 = vpop.permute.xlu1 %1441  ;;  %v1438_v41 = vpop.permute.xlu2 %1437 }
 0x30d   : > { %v1346_v14 = vpop.permute.xlu0 %1345  ;;  %v1767_v37 = vsel %vm1764_vm7, %v1734_v63, %v1442_v32 }
 0x30e   : > { %v1750_v24 = vsel %vm1731_vm6, %v1717_v54, %v1346_v14  ;;  %2283 = vmatpush.xpose.msk.msra.mxu0 %vm1798_vm8, %v1767_v37 }
 0x30f   : > { %v1783_v16 = vsel %vm1764_vm7, %v1750_v24, %v1474_v2 }
 0x310   : > { %2300 = vmatpush.xpose.msk.msra.mxu1 %vm1798_vm8, %v1783_v16 }
 0x314   : > { %v1312_v62 = vpop.permute.xlu1 %1311 }
 0x315   : > { %v1216_v30 = vpop.permute.xlu0 %1215  ;;  %v1733_v26 = vsel %vm1731_vm6, %v3527_v57, %v1312_v62  ;;  %v1797_v57 = vld [vmem:[%s4069_s1] sm:$0xff] }
 0x316   : > { %v1716_v44 = vsel %vm1698_vm5, %v3462_v29, %v1216_v30 }
 0x317   : > { %v1749_v46 = vsel %vm1731_vm6, %v1716_v44, %v1344_v1 }
 0x31c   : > { %v1472_v59 = vpop.permute.xlu1 %1471 }
 0x31d   : > { %v1440_v43 = vpop.permute.xlu0 %1439  ;;  %v1782_v52 = vsel %vm1764_vm7, %v1749_v46, %v1472_v59 }
 0x31e   : > { %v1766_v4 = vsel %vm1764_vm7, %v1733_v26, %v1440_v43  ;;  %2301 = vmatpush.xpose.msk.msra.mxu1 %vm1798_vm8, %v1782_v52 }
 0x31f   : > { %2284 = vmatpush.xpose.msk.msra.mxu0 %vm1798_vm8, %v1766_v4 }
 0x324   : > { %v1342_v27 = vpop.permute.xlu1 %1341 }
 0x325   : > { %v1310_v38 = vpop.permute.xlu0 %1309  ;;  %v1748_v10 = vsel %vm1731_vm6, %v1715_v36, %v1342_v27 }
 0x326   : > { %v1732_v29 = vsel %vm1731_vm6, %v3628_v23, %v1310_v38 }
 0x327   : > { %v1765_v33 = vsel %vm1764_vm7, %v1732_v29, %v1438_v41 }
 0x328   : > { %2285 = vmatpush.xpose.msk.msra.mxu0 %vm1798_vm8, %v1765_v33 }
 0x32b   : > { %2286 = vmatmul.msk.f32.vlgmr.msra.gmra.mxu0 %vm1798_vm8, %v1797_v57 }
 0x32d   : > { %v1470_v18 = vpop.permute.xlu0 %1469 }
 0x32e   : > { %v1781_v23 = vsel %vm1764_vm7, %v1748_v10, %v1470_v18 }
 0x32f   : > { %2302 = vmatpush.xpose.msk.msra.mxu1 %vm1798_vm8, %v1781_v23 }
 0x332   : > { %2303 = vmatmul.msk.f32.vlgmr.msra.gmra.mxu1 %vm1798_vm8, %v1797_v57 }
 0x3a8   : > { %v1915_v48 = vpop.f32.mrf.mxu0 }
 0x3a9   : > { %1938 = vst [vmem:[%s210_s8] sm:$0xff] %v1915_v48  ;;  %v1945_v45 = vmul.f32 %v1915_v48, %v1915_v48 }
 0x3af   : > { %v1935_v35 = vpop.f32.mrf.mxu1 }
 0x3b0   : > { %1939 = vst [vmem:[%s210_s8 + $0x8] sm:$0xff] %v1935_v35  ;;  %v1940_v49 = vadd.f32 %v1935_v35, %v1915_v48  ;;  %v1946_v6 = vmul.f32 %v1935_v35, %v1935_v35 }
 0x3b2   : > { %v1947_v25 = vadd.f32 %v1946_v6, %v1945_v45  ;;  %1941 = vadd.xlane.f32.xlu1 %v1940_v49 }
 0x3b4   : > { %1948 = vadd.xlane.f32.xlu2 %v1947_v25 }
 0x425   : > { %v1942_v60 = vpop.xlane.xlu1 %1941 }
 0x426   : > { %1944 = vst.msk [vmem:[%s214_s12] sm:$0xff] %vm1943_vm9, %v1942_v60 }
 0x427   : > { %v1949_v20 = vpop.xlane.xlu2 %1948 }
 0x428   : > { %1950 = vst.msk [vmem:[%s218_s17] sm:$0xff] %vm1943_vm9, %v1949_v20 }
 0x429 PF: > { %s15_s15 = sadd.s32 1, %s2335_s15  }
 0x42a   : > { %p12_p4 = scmp.ge.s32.totalorder %s15_s15, 4  }
 0x42c   :  { %14 = sbr.rel (!%p12_p4) target bundleno = 1 (0x1), region = 84 }

</bundles_post_ra>
